<compile_context>
chip_gen: v7x
topology: tpu7x:2x2x1
jax: 0.10.0
libtpu: 0.0.40
codegen_flags: <defaults>
</compile_context>

<pallas_src>
import jax
import jax.numpy as jnp
from jax.experimental import pallas as pl
from jax.experimental.pallas import tpu as pltpu


def _cat_projection_kernel(x_ref, w_ref, b_ref, o_ref):
    """One (row-block, col-block) tile of the ConvTranspose1d-as-GEMM.

    x_ref: (TR, GD)  bf16  im2col rows (each row = G stacked, shifted patch vectors)
    w_ref: (GD, TN)  bf16  taps regrouped so one GEMM yields the (T'//S, S*C) view
    b_ref: (1,  TN)  f32   bias tiled S times (column slice)
    o_ref: (TR, TN)  f32   contiguous, lane-dense output slab
    """
    o_ref[...] = (
        jnp.dot(x_ref[...], w_ref[...], preferred_element_type=jnp.float32)
        + b_ref[...]
    )


def _round_up(v, m):
    return -(-v // m) * m


def _pick_tiles(R, GD, SC, C):
    """Pick (row tile, col tile) that fill the MXU and fit comfortably in VMEM."""
    budget = 18 * 1024 * 1024  # bytes reserved for double-buffered blocks (v5e-safe)

    # Column tile: a multiple of C (hence of 128) that divides S*C and keeps the
    # resident weight slice small.
    S = SC // C
    tn = C
    for s_div in range(S, 0, -1):
        cand = s_div * C
        if S % s_div:
            continue
        if cand != SC and cand % 128:
            continue
        if cand <= 8192 and 2 * GD * cand * 2 <= budget // 3:
            tn = cand
            break

    # Row tile: largest multiple of 8 (<= 512) fitting the remaining budget.
    w_bytes = 2 * GD * tn * 2                 # weight slice (conservatively 2-buffered)
    per_row = 2 * (tn * 4 + GD * 2)           # double-buffered f32 out + bf16 lhs per row
    tr = max(8, min(512, (budget - w_bytes) // per_row, _round_up(R, 8)))
    tr = max(8, (tr // 8) * 8)

    # Keep >= 2 grid steps whenever possible so both v7x TensorCores get work.
    if SC // tn == 1 and R > 8:
        tr = min(tr, _round_up(-(-R // 2), 8))
    return tr, tn


def cat_projection(x, weight, bias, *, patch_size, stride_size):
    """x: (B, M, N, D); weight: (D, C_out, P) [torch ConvTranspose1d layout]; bias: (C_out,)."""
    B, M, N, D = x.shape
    C = weight.shape[1]
    P = patch_size
    S = stride_size
    T = (N - 1) * S + P
    G = -(-P // S)                    # ceil(P/S): max taps overlapping one output position
    Pp = G * S                        # taps zero-padded to a multiple of S
    TPS = N + G - 1                   # T' // S  with  T' = (N-1)*S + Pp >= T
    Tp = TPS * S
    BM = B * M
    SC = S * C
    GD = G * D

    # ---- wrapper-side layout plumbing (tiny vs. the output bytes) --------------------
    # im2col for the transposed conv:  x_cat[(bm, q), g*D + d] = x[bm, q - g, d]
    xr = x.reshape(BM, N, D).astype(jnp.float32)
    shifted = [jnp.pad(xr, ((0, 0), (g, G - 1 - g), (0, 0))) for g in range(G)]
    x_cat = jnp.stack(shifted, axis=2).reshape(BM * TPS, GD).astype(jnp.bfloat16)

    # w_cat[g*D + d, s*C + c] = weight[d, c, g*S + s]   (zero for the padded taps)
    w_pad = jnp.pad(weight.astype(jnp.float32), ((0, 0), (0, 0), (0, Pp - P)))
    w_cat = (
        jnp.transpose(w_pad, (2, 0, 1))      # (Pp, D, C)
        .reshape(G, S, D, C)
        .transpose(0, 2, 1, 3)               # (G, D, S, C)
        .reshape(GD, SC)
        .astype(jnp.bfloat16)
    )
    b_cat = jnp.tile(bias.astype(jnp.float32), S).reshape(1, SC)

    R = BM * TPS
    TR, TN = _pick_tiles(R, GD, SC, C)
    n_rows = pl.cdiv(R, TR)
    n_cols = SC // TN
    R_pad = n_rows * TR
    if R_pad != R:
        x_cat = jnp.pad(x_cat, ((0, R_pad - R), (0, 0)))   # padded rows give bias only; cropped

    out = pl.pallas_call(
        _cat_projection_kernel,
        out_shape=jax.ShapeDtypeStruct((R_pad, SC), jnp.float32),
        grid_spec=pltpu.PrefetchScalarGridSpec(
            num_scalar_prefetch=0,
            grid=(n_cols, n_rows),            # cols outer -> weight/bias slice stays resident
            in_specs=[
                pl.BlockSpec((TR, GD), lambda j, i: (i, 0)),
                pl.BlockSpec((GD, TN), lambda j, i: (0, j)),
                pl.BlockSpec((1, TN), lambda j, i: (0, j)),
            ],
            out_specs=pl.BlockSpec((TR, TN), lambda j, i: (i, j)),
        ),
        compiler_params=pltpu.CompilerParams(
            dimension_semantics=("parallel", "parallel"),
            vmem_limit_bytes=32 * 1024 * 1024,
        ),
    )(x_cat, w_cat, b_cat)

    # (R_pad, S*C) -> (BM, T'//S, S*C) -> (BM, T', C) -> crop T -> (B, M, T, C) -> (B, T, M, C)
    # TODO(synk): the final M<->T permute stays an XLA transpose; folding it into the kernel
    # would force (1, C)-wide output sub-blocks (violates the (8,128) block rule), so writing
    # contiguous lane-dense (TR, TN) slabs and transposing outside is cheaper.
    out = out[:R].reshape(BM, Tp, C)[:, :T, :]
    return out.reshape(B, M, T, C).transpose(0, 2, 1, 3)


def cat_projection_reference(x, weight, bias, *, patch_size, stride_size):
    """Pure-JAX (f32) reference of the ConvTranspose1d forward, for verification."""
    B, M, N, D = x.shape
    C = weight.shape[1]
    P = patch_size
    S = stride_size
    T = (N - 1) * S + P
    xr = x.reshape(B * M, N, D).astype(jnp.float32)
    out = jnp.zeros((B * M, T, C), jnp.float32) + bias.astype(jnp.float32)
    for k in range(P):
        contrib = jnp.einsum("bnd,dc->bnc", xr, weight[:, :, k].astype(jnp.float32))
        idx = jnp.arange(N) * S + k
        out = out.at[:, idx, :].add(contrib)
    return out.reshape(B, M, T, C).transpose(0, 2, 1, 3)


if __name__ == "__main__":
    # Module hyper-params (small, consistent with the forward's shape algebra).
    d_model = 32
    patch_size = 8
    stride_size = 4
    C_out = 1024  # fixed by the module

    B, M, N = 2, 4, 8

    key = jax.random.PRNGKey(0)
    k_x, k_w, k_b = jax.random.split(key, 3)

    x = jax.random.normal(k_x, (B, M, N, d_model), dtype=jnp.float32)
    # Torch ConvTranspose1d weight layout: (in_channels, out_channels, kernel_size).
    weight = 0.02 * jax.random.normal(k_w, (d_model, C_out, patch_size), dtype=jnp.float32)
    bias = 0.01 * jax.random.normal(k_b, (C_out,), dtype=jnp.float32)

    out = cat_projection(x, weight, bias, patch_size=patch_size, stride_size=stride_size)
    out = jax.block_until_ready(out)

    ref = cat_projection_reference(x, weight, bias, patch_size=patch_size, stride_size=stride_size)
    ref = jax.block_until_ready(ref)

    T = (N - 1) * stride_size + patch_size
    assert out.shape == (B, T, M, C_out), f"bad shape {out.shape}"
    assert jnp.allclose(out, ref, rtol=2e-2, atol=2e-2), "mismatch vs reference"

    print("KERNEL_OK")
</pallas_src>

<mosaic_0001>
module attributes {stable_mosaic.version = 11 : i64} {
  func.func @_cat_projection_kernel(%arg0: i32, %arg1: i32, %arg2: memref<40x64xbf16, #tpu.memory_space<vmem>>, %arg3: memref<64x4096xbf16, #tpu.memory_space<vmem>>, %arg4: memref<1x4096xf32, #tpu.memory_space<vmem>>, %arg5: memref<40x4096xf32, #tpu.memory_space<vmem>>) attributes {dimension_semantics = [#tpu.dimension_semantics<parallel>, #tpu.dimension_semantics<parallel>], iteration_bounds = array<i64: 1, 2>, scalar_prefetch = 0 : i64, scratch_operands = 0 : i64, tpu.core_type = #tpu.core_type<tc>, window_params = [{transform_indices = @transform_0, window_bounds = array<i64: 40, 64>}, {transform_indices = @transform_1, window_bounds = array<i64: 64, 4096>}, {transform_indices = @transform_2, window_bounds = array<i64: 1, 4096>}, {transform_indices = @transform_3, window_bounds = array<i64: 40, 4096>}]} {
    %c0 = arith.constant 0 : index
    %c0_0 = arith.constant 0 : index
    %0 = vector.load %arg2[%c0, %c0_0] : memref<40x64xbf16, #tpu.memory_space<vmem>>, vector<40x64xbf16>
    %c0_1 = arith.constant 0 : index
    %c0_2 = arith.constant 0 : index
    %1 = vector.load %arg3[%c0_1, %c0_2] : memref<64x4096xbf16, #tpu.memory_space<vmem>>, vector<64x4096xbf16>
    %cst = arith.constant dense<0.000000e+00> : vector<40x4096xf32>
    %2 = tpu.matmul %0, %1, %cst {dimension_numbers = #tpu.dot_dimension_numbers<[1], [0], [0], [1], [0, 0, 1, 1], [], []>} : vector<40x64xbf16>, vector<64x4096xbf16>, vector<40x4096xf32> -> vector<40x4096xf32>
    %c0_3 = arith.constant 0 : index
    %c0_4 = arith.constant 0 : index
    %3 = vector.load %arg4[%c0_3, %c0_4] : memref<1x4096xf32, #tpu.memory_space<vmem>>, vector<1x4096xf32>
    %4 = vector.broadcast %3 : vector<1x4096xf32> to vector<40x4096xf32>
    %5 = arith.addf %2, %4 : vector<40x4096xf32>
    %c0_5 = arith.constant 0 : index
    %c0_6 = arith.constant 0 : index
    %6 = vector.load %arg5[%c0_5, %c0_6] : memref<40x4096xf32, #tpu.memory_space<vmem>>, vector<40x4096xf32>
    tpu.vector_store %arg5[%c0_5, %c0_6], %5 {strides = array<i32>} : memref<40x4096xf32, #tpu.memory_space<vmem>>, vector<40x4096xf32>,
    return
  }
  func.func @transform_0(%arg0: i32, %arg1: i32) -> (i32, i32) {
    %c0_i32 = arith.constant 0 : i32
    %c0_i32_0 = arith.constant 0 : i32
    return %arg1, %c0_i32 : i32, i32
  }
  func.func @transform_1(%arg0: i32, %arg1: i32) -> (i32, i32) {
    %c0_i32 = arith.constant 0 : i32
    %c0_i32_0 = arith.constant 0 : i32
    return %c0_i32, %arg0 : i32, i32
  }
  func.func @transform_2(%arg0: i32, %arg1: i32) -> (i32, i32) {
    %c0_i32 = arith.constant 0 : i32
    %c0_i32_0 = arith.constant 0 : i32
    return %c0_i32, %arg0 : i32, i32
  }
  func.func @transform_3(%arg0: i32, %arg1: i32) -> (i32, i32) {
    %c0_i32 = arith.constant 0 : i32
    return %arg1, %arg0 : i32, i32
  }
}

</mosaic_0001>

<bundles_post_ra>
// kernel: tpu_custom_call.1
= control target key start
LH: loop header
LB: loop body
LE: loop exit
PB: predicated region body
PF: predicated region fallthrough
CT: control target
= control target key end

     0   :  { %8 = vsyncpa [#allocation3], 0  ;;  %s3512_s0 = inlined_call_operand.vmem [shape: bf16[80,64], index: 0, kind: input, shape index: {}]   ;;  %s3513_s1 = inlined_call_operand.hbm [shape: bf16[64,4096], index: 1, kind: input, shape index: {}]   ;;  %s3514_s2 = inlined_call_operand.hbm [shape: f32[1,4096], index: 2, kind: input, shape index: {}]   ;;  %s3515_s3 = inlined_call_operand.hbm [shape: f32[80,4096], index: 3, kind: output, shape index: {}]  }
   0x1   :  { %9 = vsyncpa [#allocation6], 0 }
   0x2   :  { %10 = vsyncpa [#allocation4], 0 }
   0x3   :  { %12 = vsyncpa [#allocation4 + $0x1], 0  ;;  %s2903_s12 = smov 0   ;;  %s2905_s13 = smov 0  }
   0x4   :  { %s2907_s14 = smov 0   ;;  %s2909_s15 = smov 0  }
   0x5   :  { %s2911_s16 = smov 0   ;;  %s2913_s17 = smov 0  }
   0x6 LB: > { %s2450_s18 = sadd.s32 4294967295, %s2873_s17   ;;  %s2451_s19 = sadd.s32 4294967294, %s2873_s17   ;;  %s2873_s17 = sphi %s2913_s17, %s18_s17   ;;  %s2869_s16 = sphi %s2911_s16, %s3533_s16   ;;  %s2865_s15 = sphi %s2909_s15, %s3532_s15   ;;  %s2861_s14 = sphi %s2907_s14, %s3531_s14   ;;  %s2857_s13 = sphi %s2905_s13, %s3530_s13   ;;  %s2853_s12 = sphi %s2903_s12, %s3529_s12  }
   0x7   : > { %s27_s20 = sadd.s32 1, %s2869_s16  ;;  %s117_s21 = sadd.s32 1, %s2861_s14 }
   0x8   : > { %p28_p0 = scmp.ge.s32.totalorder %s27_s20, 2  ;;  %p127_p1 = scmp.ne.s32.totalorder %s2861_s14, %s2857_s13 }
   0x9   : > { %p128_p2 = scmp.eq.s32.totalorder %s2450_s18, 1  ;;  %p133_p3 = scmp.ne.s32.totalorder %s2857_s13, %s2853_s12 }
   0xa   : > { %s3535_s20 = smov (%p28_p0, %s27_s20), 0  ;;  %p134_p5 = scmp.eq.s32.totalorder %s2451_s19, 1 }
   0xb   : > { %p2943_p4 = por %p128_p2, %p127_p1  ;;  %s112_s23 = ssub.s32 %s2869_s16, %s3535_s20 }
   0xc   : > { %p2452_p6 = scmp.ge.s32.totalorder %s2873_s17, 1  ;;  %p115_p7 = scmp.eq.s32.totalorder %s112_s23, 0 }
   0xd   : > { %s3520_s22 = scalar_select %p2943_p4, 1, 0 }
   0xe   : > { %p2950_p8 = por %p134_p5, %p133_p3  ;;  %p141_p9 = scmp.lt.s32.totalorder %s2873_s17, 3 }
   0xf   : > { %s2956_s25 = scalar_select %p115_p7, %s2861_s14, %s117_s21  }
  0x10   : > { %s3521_s24 = scalar_select %p2950_p8, 1, 0 }
  0x11   : > { %p2958_p10 = pnand %p2452_p6, %p141_p9  ;;  %p2962_p11 = scmp.eq.s32.totalorder %s2450_s18, 0 }
  0x12   : > { %s2875_s28 = smov [#allocation2]   ;;  %s2876_s4 = smov [#allocation5]  }
  0x13   : > { %s3522_s26 = scalar_select %p2958_p10, 1, 0 }
  0x14   : > { %s3523_s27 = scalar_select %p2962_p11, 1, 0 }
  0x15   : > { %p2657_p12 = pneg %p2958_p10  ;;  %s156_s29 = sshll.u32 %s2875_s28, 4  ;;  %s157_s29 = int_to_ptr.vmem [resolvable:$true] %s156_s29 }
  0x16   : > { %s173_s5 = sshll.u32 %s2876_s4, 4  ;;  %s2731_s8 = scalar_lea.hbm %s3513_s1, 16384  ;;  %s2974_s5 = int_to_ptr.vmem [resolvable:$true] %s173_s5 }
  0x17   : > { %p2970_p13 = pnand %p2962_p11, %p2657_p12  ;;  %p2732_p0 = scmp.ne.s32.totalorder %s3513_s1, %s2731_s8 }
  0x18   : > { %p2738_p5 = scmp.lt.u32.totalorder %s2731_s8, %s3513_s1 }
  0x19   : > { %p2733_p1 = pneg %p2970_p13 }
  0x1b   : > { %p2734_p2 = pnand %p2733_p1, %p2732_p0 }
  0x1d   : > { %p2735_p3 = pneg %p2734_p2 }
  0x1f   : > { %p2740_p6 = pnand %p2738_p5, %p2735_p3 }
  0x21   : > { %2743 = shalt.err (!%p2740_p6)
}
  0x22   : > { %s2744_s19 = scalar_lea.vmem %s157_s29, 16384  ;;  %p2752_p8 = scmp.lt.s32.totalorder %s157_s29, %s157_s29 }
  0x23   : > { %p2745_p7 = scmp.ne.s32.totalorder %s157_s29, %s2744_s19  ;;  %p2753_p4 = scmp.lt.s32.totalorder %s2744_s19, %s2744_s19 }
  0x25   : > { %p2747_p9 = pnand %p2745_p7, %p2733_p1  ;;  %p2754_p11 = por %p2753_p4, %p2752_p8 }
  0x27   : > { %p2748_p12 = pneg %p2747_p9 }
  0x29   : > { %p2755_p10 = pnand %p2754_p11, %p2748_p12 }
  0x2b   : > { %2758 = shalt.err (!%p2755_p10)
}
  0x2c   : > { %s2877_s21 = smov 2048   ;;  %s2878_s23 = smov 128  }
  0x2d   : > { %2660 = dma.hbm_to_vmem [thread:$0]  (!%p2970_p13), %s3513_s1, 16384, %s157_s29, [#allocation3], %s2877_s21, %s2877_s21, %s2878_s23  }
  0x2e   : > { %s2759_s8 = scalar_lea.hbm %s3514_s2, 512 }
  0x2f   : > { %p2760_p0 = scmp.ne.s32.totalorder %s3514_s2, %s2759_s8  ;;  %p2766_p10 = scmp.lt.u32.totalorder %s2759_s8, %s3514_s2 }
  0x31   : > { %p2762_p4 = pnand %p2760_p0, %p2733_p1 }
  0x33   : > { %p2763_p8 = pneg %p2762_p4 }
  0x35   : > { %p2768_p11 = pnand %p2766_p10, %p2763_p8 }
  0x37   : > { %2771 = shalt.err (!%p2768_p11)
}
  0x38   : > { %s2772_s29 = scalar_lea.vmem %s2974_s5, 512  ;;  %p2780_p6 = scmp.lt.s32.totalorder %s2974_s5, %s2974_s5 }
  0x39   : > { %p2773_p2 = scmp.ne.s32.totalorder %s2974_s5, %s2772_s29  ;;  %p2781_p7 = scmp.lt.s32.totalorder %s2772_s29, %s2772_s29 }
  0x3b   : > { %p2775_p3 = pnand %p2773_p2, %p2733_p1  ;;  %p2782_p9 = por %p2781_p7, %p2780_p6 }
  0x3d   : > { %p2776_p5 = pneg %p2775_p3 }
  0x3f   : > { %p2783_p12 = pnand %p2782_p9, %p2776_p5 }
  0x41   : > { %2786 = shalt.err (!%p2783_p12)
}
  0x42   : > { %2663 = dma.hbm_to_vmem [thread:$0]  (!%p2970_p13), %s3514_s2, 512, %s2974_s5, [#allocation6]  }
  0x43   : > { %p3525_p0 = scmp.ne.s32.totalorder %s3522_s26, 0 }
  0x44   : > { %p3526_p4 = scmp.ne.s32.totalorder (!%p3525_p0), %s3523_s27, 0 }
  0x45   : > { %195 = sbr.rel (%p3525_p0) target bundleno = 513 (0x201), region = 32 }
  0x4c   : > { %2840 = dma.done.wait (%p3526_p4), [#allocation3], 16384  }
  0x4d   : > { %2842 = vsyncadd (%p3526_p4), [#allocation3], 4294950912 }
  0x4e   : > { %2844 = dma.done.wait (%p3526_p4), [#allocation6], 512  }
  0x4f   : > { %2846 = vsyncadd (%p3526_p4), [#allocation6], 4294966784  ;;  %s223_s30 = smul.u32 5, %s2865_s15  ;;  %v2879_v0 = vmov 0   ;;  %v239_v1 = vld [vmem:[#allocation2] sm:$0xff]  ;;  %v240_v3 = vld [vmem:[#allocation2 + $0x8] sm:$0xff] }
  0x50   : > { %1230 = vmatprep.mubr.bf16.mxu0 %v2879_v0  ;;  %1291 = vmatprep.mubr.bf16.mxu1 %v2879_v0  ;;  %v255_v2 = vld [vmem:[#allocation2 + $0x80] sm:$0xff]  ;;  %v256_v5 = vld [vmem:[#allocation2 + $0x88] sm:$0xff]  ;;  %v241_v31 = vld [vmem:[#allocation2 + $0x10] sm:$0xff]  ;;  %vm1188_vm0 = vcmask 523264   ;;  %s220_s28 = sand.u32 1, %s2857_s13   ;;  %s2645_s7 = smul.u32 20480, %s2865_s15 }
  0x51   : > { %p224_p13 = scmp.lt.s32.totalorder %s223_s30, 9  ;;  %v2464_v4 = vcombine.high %v239_v1, %v255_v2  ;;  %v2463_v6 = vcombine.low %v239_v1, %v255_v2  ;;  %v271_v7 = vld [vmem:[#allocation2 + $0x100] sm:$0xff]  ;;  %v2466_v9 = vcombine.high %v240_v3, %v256_v5  ;;  %v2465_v10 = vcombine.low %v240_v3, %v256_v5  ;;  %v272_v12 = vld [vmem:[#allocation2 + $0x108] sm:$0xff]  ;;  %v257_v32 = vld [vmem:[#allocation2 + $0x90] sm:$0xff]  ;;  %s2646_s4 = smul.u32 1280, %s220_s28 }
  0x52   : > { %v287_v8 = vld [vmem:[#allocation2 + $0x180] sm:$0xff]  ;;  %v288_v13 = vld [vmem:[#allocation2 + $0x188] sm:$0xff]  ;;  %v242_v33 = vld [vmem:[#allocation2 + $0x18] sm:$0xff]  ;;  %v2468_v37 = vcombine.high %v241_v31, %v257_v32  ;;  %v2467_v44 = vcombine.low %v241_v31, %v257_v32  ;;  %s3456_s11 = scalar_lea.hbm %s3515_s3, %s2645_s7  ;;  %s3466_s15 = scalar_lea.sflag [#allocation4], %s220_s28 }
  0x53   : > { %s3537_s30 = smov (!%p224_p13, %s223_s30), 9  ;;  %v2496_v11 = vcombine.high %v271_v7, %v287_v8  ;;  %v303_v14 = vld [vmem:[#allocation2 + $0x200] sm:$0xff]  ;;  %1198 = vmatprep.subr.bf16.mxu0 %v2464_v4  ;;  %v2498_v15 = vcombine.high %v272_v12, %v288_v13  ;;  %v304_v17 = vld [vmem:[#allocation2 + $0x208] sm:$0xff]  ;;  %1259 = vmatprep.subr.bf16.mxu1 %v2466_v9  ;;  %v2495_v19 = vcombine.low %v271_v7, %v287_v8  ;;  %v258_v34 = vld [vmem:[#allocation2 + $0x98] sm:$0xff]  ;;  %s3219_s6 = scalar_lea.vmem [#allocation7], %s2646_s4 }
  0x54   : > { %s2459_s26 = sshll.u32 %s3537_s30, 2  ;;  %v319_v16 = vld [vmem:[#allocation2 + $0x280] sm:$0xff]  ;;  %v320_v18 = vld [vmem:[#allocation2 + $0x288] sm:$0xff]  ;;  %1199 = vmatpush1.bf16.msra.mxu0 %v2463_v6  ;;  %1260 = vmatpush1.bf16.msra.mxu1 %v2465_v10  ;;  %v2497_v20 = vcombine.low %v272_v12, %v288_v13  ;;  %v2470_v38 = vcombine.high %v242_v33, %v258_v34  ;;  %v273_v39 = vld [vmem:[#allocation2 + $0x110] sm:$0xff]  ;;  %v2469_v45 = vcombine.low %v242_v33, %v258_v34  ;;  %s2351_s8 = sshll.u32 %s3219_s6, 4  ;;  %s3458_s8 = int_to_ptr.vmem [resolvable:$true] %s2351_s8 }
  0x55   : > { %s3039_s23 = scalar_lea.vmem %s3512_s0, %s2459_s26  ;;  %1200 = vmatprep.subr.bf16.mxu0 %v2496_v11  ;;  %v2528_v21 = vcombine.high %v303_v14, %v319_v16  ;;  %1261 = vmatprep.subr.bf16.mxu1 %v2498_v15  ;;  %v2530_v22 = vcombine.high %v304_v17, %v320_v18  ;;  %v335_v23 = vld [vmem:[#allocation2 + $0x300] sm:$0xff]  ;;  %v336_v25 = vld [vmem:[#allocation2 + $0x308] sm:$0xff]  ;;  %v2527_v27 = vcombine.low %v303_v14, %v319_v16  ;;  %v289_v40 = vld [vmem:[#allocation2 + $0x190] sm:$0xff]  ;;  %s2787_s18 = scalar_lea.vmem %s3458_s8, 20480 }
  0x56   : > { %v351_v24 = vld [vmem:[#allocation2 + $0x380] sm:$0xff]  ;;  %v352_v26 = vld [vmem:[#allocation2 + $0x388] sm:$0xff]  ;;  %v2529_v28 = vcombine.low %v304_v17, %v320_v18  ;;  %v3042_v41 = vld [vmem:[%s3039_s23] sm:$0xff]   ;;  %v2500_v46 = vcombine.high %v273_v39, %v289_v40  ;;  %v2499_v52 = vcombine.low %v273_v39, %v289_v40  ;;  %p2788_p1 = scmp.ne.s32.totalorder %s3458_s8, %s2787_s18  ;;  %p3527_p8 = scmp.ne.s32.totalorder %s3520_s22, 0 }
  0x57   : > { %v2560_v29 = vcombine.high %v335_v23, %v351_v24  ;;  %v2562_v30 = vcombine.high %v336_v25, %v352_v26  ;;  %v2559_v35 = vcombine.low %v335_v23, %v351_v24  ;;  %v2561_v36 = vcombine.low %v336_v25, %v352_v26  ;;  %v274_v42 = vld [vmem:[#allocation2 + $0x118] sm:$0xff]  ;;  %v305_v48 = vld [vmem:[#allocation2 + $0x210] sm:$0xff]  ;;  %v3051_v56 = vld [vmem:[%s3039_s23 + $0x8] sm:$0xff]   ;;  %s2880_s29 = smov [#allocation7]  }
  0x58   : > { %1201 = vmatpush1.bf16.msra.mxu0 %v2495_v19  ;;  %1262 = vmatpush1.bf16.msra.mxu1 %v2497_v20  ;;  %v290_v43 = vld [vmem:[#allocation2 + $0x198] sm:$0xff]  ;;  %v321_v49 = vld [vmem:[#allocation2 + $0x290] sm:$0xff]  ;;  %v243_v1 = vld [vmem:[#allocation2 + $0x20] sm:$0xff]  ;;  %p2789_p10 = pnand %p2788_p1, %p3527_p8  ;;  %s2791_s19 = sshll.u32 %s2880_s29, 4  ;;  %s2792_s19 = int_to_ptr.vmem [resolvable:$false] %s2791_s19 }
  0x59   : > { %1202 = vmatprep.subr.bf16.mxu0 %v2528_v21  ;;  %1263 = vmatprep.subr.bf16.mxu1 %v2530_v22  ;;  %v2502_v47 = vcombine.high %v274_v42, %v290_v43  ;;  %v306_v50 = vld [vmem:[#allocation2 + $0x218] sm:$0xff]  ;;  %v2501_v53 = vcombine.low %v274_v42, %v290_v43  ;;  %v2532_v54 = vcombine.high %v305_v48, %v321_v49  ;;  %v337_v57 = vld [vmem:[#allocation2 + $0x310] sm:$0xff]  ;;  %v259_v2 = vld [vmem:[#allocation2 + $0xa0] sm:$0xff]  ;;  %s2793_s21 = scalar_lea.vmem %s2792_s19, 40960  ;;  %p2794_p2 = scmp.lt.s32.totalorder %s3458_s8, %s2792_s19 }
  0x5a   : > { %v322_v51 = vld [vmem:[#allocation2 + $0x298] sm:$0xff]  ;;  %v353_v58 = vld [vmem:[#allocation2 + $0x390] sm:$0xff]  ;;  %v2531_v59 = vcombine.low %v305_v48, %v321_v49  ;;  %v244_v4 = vld [vmem:[#allocation2 + $0x28] sm:$0xff]  ;;  %v2472_v8 = vcombine.high %v243_v1, %v259_v2  ;;  %v2471_v15 = vcombine.low %v243_v1, %v259_v2  ;;  %p2790_p11 = pneg %p2789_p10  ;;  %p2795_p3 = scmp.lt.s32.totalorder %s2793_s21, %s2787_s18 }
  0x5b   : > { %v2534_v55 = vcombine.high %v306_v50, %v322_v51  ;;  %v338_v60 = vld [vmem:[#allocation2 + $0x318] sm:$0xff]  ;;  %v2533_v62 = vcombine.low %v306_v50, %v322_v51  ;;  %v2564_v63 = vcombine.high %v337_v57, %v353_v58  ;;  %v260_v5 = vld [vmem:[#allocation2 + $0xa8] sm:$0xff]  ;;  %v2563_v6 = vcombine.low %v337_v57, %v353_v58  ;;  %v275_v11 = vld [vmem:[#allocation2 + $0x120] sm:$0xff] }
  0x5c   : > { %1203 = vmatpush1.bf16.msra.mxu0 %v2527_v27  ;;  %1264 = vmatpush1.bf16.msra.mxu1 %v2529_v28  ;;  %v354_v61 = vld [vmem:[#allocation2 + $0x398] sm:$0xff]  ;;  %v2474_v9 = vcombine.high %v244_v4, %v260_v5  ;;  %v3060_v10 = vld [vmem:[%s3039_s23 + $0x10] ss:$0 sps:$4 sm:$0xff]   ;;  %v291_v12 = vld [vmem:[#allocation2 + $0x1a0] sm:$0xff]  ;;  %v2473_v16 = vcombine.low %v244_v4, %v260_v5  ;;  %p2796_p5 = por %p2795_p3, %p2794_p2 }
  0x5d   : > { %1204 = vmatprep.subr.bf16.mxu0 %v2560_v29  ;;  %1265 = vmatprep.subr.bf16.mxu1 %v2562_v30  ;;  %v2566_v3 = vcombine.high %v338_v60, %v354_v61  ;;  %v2565_v7 = vcombine.low %v338_v60, %v354_v61  ;;  %v276_v13 = vld [vmem:[#allocation2 + $0x128] sm:$0xff]  ;;  %v2504_v17 = vcombine.high %v275_v11, %v291_v12  ;;  %v307_v19 = vld [vmem:[#allocation2 + $0x220] sm:$0xff]  ;;  %v245_v34 = vld [vmem:[#allocation2 + $0x30] sm:$0xff] }
  0x5e   : > { %v292_v14 = vld [vmem:[#allocation2 + $0x1a8] sm:$0xff]  ;;  %v323_v20 = vld [vmem:[#allocation2 + $0x2a0] sm:$0xff]  ;;  %v2503_v23 = vcombine.low %v275_v11, %v291_v12  ;;  %v341_v61 = vld [vmem:[#allocation2 + $0x330] sm:$0xff]  ;;  %p2797_p6 = pnand %p2796_p5, %p2790_p11 }
  0x5f   : > { %v2506_v18 = vcombine.high %v276_v13, %v292_v14  ;;  %v308_v21 = vld [vmem:[#allocation2 + $0x228] sm:$0xff]  ;;  %v2505_v24 = vcombine.low %v276_v13, %v292_v14  ;;  %v2536_v25 = vcombine.high %v307_v19, %v323_v20  ;;  %v339_v27 = vld [vmem:[#allocation2 + $0x320] sm:$0xff]  ;;  %v2535_v29 = vcombine.low %v307_v19, %v323_v20  ;;  %v342_v1 = vld [vmem:[#allocation2 + $0x338] sm:$0xff] }
  0x60   : > { %1205 = vmatpush1.bf16.msra.mxu0 %v2559_v35  ;;  %1266 = vmatpush1.bf16.msra.mxu1 %v2561_v36  ;;  %v324_v22 = vld [vmem:[#allocation2 + $0x2a8] sm:$0xff]  ;;  %v355_v28 = vld [vmem:[#allocation2 + $0x3a0] sm:$0xff]  ;;  %v261_v35 = vld [vmem:[#allocation2 + $0xb0] sm:$0xff] }
  0x61   : > { %1320 = vmatprep.subr.bf16.mxu0 %v2468_v37  ;;  %1381 = vmatprep.subr.bf16.mxu1 %v2470_v38  ;;  %v2538_v26 = vcombine.high %v308_v21, %v324_v22  ;;  %v340_v30 = vld [vmem:[#allocation2 + $0x328] sm:$0xff]  ;;  %v2537_v32 = vcombine.low %v308_v21, %v324_v22  ;;  %v2568_v33 = vcombine.high %v339_v27, %v355_v28  ;;  %v246_v37 = vld [vmem:[#allocation2 + $0x38] sm:$0xff]  ;;  %v247_v5 = vld [vmem:[#allocation2 + $0x40] sm:$0xff] }
  0x62   : > { %v356_v31 = vld [vmem:[#allocation2 + $0x3a8] sm:$0xff]  ;;  %v262_v38 = vld [vmem:[#allocation2 + $0xb8] sm:$0xff]  ;;  %v2567_v39 = vcombine.low %v339_v27, %v355_v28  ;;  %v2476_v42 = vcombine.high %v245_v34, %v261_v35  ;;  %v2475_v48 = vcombine.low %v245_v34, %v261_v35 }
  0x63   : > { %2591 = vmatmul.mubr.msk.bf16.vlgmr.msra.gmra.mrb[0].mxu0 %vm1188_vm0, %v3042_v41  ;;  %2594 = vmatmul.mubr.msk.bf16.vlgmr.msra.gmra.mrb[0].mxu1 %vm1188_vm0, %v3042_v41  ;;  %v2570_v36 = vcombine.high %v340_v30, %v356_v31  ;;  %v2569_v40 = vcombine.low %v340_v30, %v356_v31  ;;  %v2478_v43 = vcombine.high %v246_v37, %v262_v38  ;;  %v358_v2 = vld [vmem:[#allocation2 + $0x3b8] sm:$0xff]  ;;  %v343_v31 = vld [vmem:[#allocation2 + $0x340] sm:$0xff]  ;;  %v344_v34 = vld [vmem:[#allocation2 + $0x348] sm:$0xff] }
  0x64   : > { %1321 = vmatpush1.bf16.msra.mxu0 %v2467_v44  ;;  %1382 = vmatpush1.bf16.msra.mxu1 %v2469_v45  ;;  %v277_v44 = vld [vmem:[#allocation2 + $0x130] sm:$0xff]  ;;  %v2477_v49 = vcombine.low %v246_v37, %v262_v38  ;;  %v2573_v12 = vcombine.low %v342_v1, %v358_v2  ;;  %v360_v35 = vld [vmem:[#allocation2 + $0x3c8] sm:$0xff] }
  0x65   : > { %1322 = vmatprep.subr.bf16.mxu0 %v2500_v46  ;;  %1383 = vmatprep.subr.bf16.mxu1 %v2502_v47  ;;  %v293_v45 = vld [vmem:[#allocation2 + $0x1b0] sm:$0xff]  ;;  %v278_v46 = vld [vmem:[#allocation2 + $0x138] sm:$0xff] }
  0x66   : > { %1240 = vmatprep.mubr.bf16.mxu0 %v2879_v0  ;;  %1301 = vmatprep.mubr.bf16.mxu1 %v2879_v0  ;;  %v294_v47 = vld [vmem:[#allocation2 + $0x1b8] sm:$0xff]  ;;  %v2508_v50 = vcombine.high %v277_v44, %v293_v45  ;;  %v2507_v57 = vcombine.low %v277_v44, %v293_v45  ;;  %v249_v38 = vld [vmem:[#allocation2 + $0x50] sm:$0xff]  ;;  %v2577_v45 = vcombine.low %v344_v34, %v360_v35 }
  0x67   : > { %v2510_v51 = vcombine.high %v278_v46, %v294_v47  ;;  %v2509_v58 = vcombine.low %v278_v46, %v294_v47 }
  0x68   : > { %1323 = vmatpush1.bf16.msra.mxu0 %v2499_v52  ;;  %1384 = vmatpush1.bf16.msra.mxu1 %v2501_v53  ;;  %v309_v52 = vld [vmem:[#allocation2 + $0x230] sm:$0xff] }
  0x69   : > { %1324 = vmatprep.subr.bf16.mxu0 %v2532_v54  ;;  %1385 = vmatprep.subr.bf16.mxu1 %v2534_v55  ;;  %v325_v53 = vld [vmem:[#allocation2 + $0x2b0] sm:$0xff]  ;;  %v310_v54 = vld [vmem:[#allocation2 + $0x238] sm:$0xff] }
  0x6a   : > { %v326_v55 = vld [vmem:[#allocation2 + $0x2b8] sm:$0xff] }
  0x6b   : > { %2592 = vmatmul.mubr.msk.bf16.gmra.mrb[4].mxu0 %vm1188_vm0, %v3051_v56  ;;  %2595 = vmatmul.mubr.msk.bf16.gmra.mrb[4].mxu1 %vm1188_vm0, %v3051_v56  ;;  %v2542_v60 = vcombine.high %v310_v54, %v326_v55 }
  0x6c   : > { %1325 = vmatpush1.bf16.msra.mxu0 %v2531_v59  ;;  %1386 = vmatpush1.bf16.msra.mxu1 %v2533_v62  ;;  %v2540_v59 = vcombine.high %v309_v52, %v325_v53  ;;  %v357_v62 = vld [vmem:[#allocation2 + $0x3b0] sm:$0xff] }
  0x6d   : > { %1250 = vmatprep.mubr.bf16.mxu0 %v2879_v0  ;;  %1311 = vmatprep.mubr.bf16.mxu1 %v2879_v0  ;;  %v2572_v4 = vcombine.high %v341_v61, %v357_v62  ;;  %v2571_v11 = vcombine.low %v341_v61, %v357_v62 }
  0x6e   : > { %1326 = vmatprep.subr.bf16.mxu0 %v2564_v63  ;;  %1387 = vmatprep.subr.bf16.mxu1 %v2566_v3  ;;  %v2539_v63 = vcombine.low %v309_v52, %v325_v53  ;;  %v2541_v3 = vcombine.low %v310_v54, %v326_v55 }
  0x70   : > { %1327 = vmatpush1.bf16.msra.mxu0 %v2563_v6  ;;  %1388 = vmatpush1.bf16.msra.mxu1 %v2565_v7  ;;  %v263_v6 = vld [vmem:[#allocation2 + $0xc0] sm:$0xff]  ;;  %v2574_v7 = vcombine.high %v342_v1, %v358_v2  ;;  %v345_v2 = vld [vmem:[#allocation2 + $0x350] sm:$0xff] }
  0x71   : > { %1442 = vmatprep.subr.bf16.mxu0 %v2472_v8  ;;  %1503 = vmatprep.subr.bf16.mxu1 %v2474_v9  ;;  %v248_v8 = vld [vmem:[#allocation2 + $0x48] sm:$0xff]  ;;  %v2480_v13 = vcombine.high %v247_v5, %v263_v6  ;;  %v2479_v19 = vcombine.low %v247_v5, %v263_v6  ;;  %v346_v5 = vld [vmem:[#allocation2 + $0x358] sm:$0xff] }
  0x72   : > { %v264_v9 = vld [vmem:[#allocation2 + $0xc8] sm:$0xff]  ;;  %v362_v6 = vld [vmem:[#allocation2 + $0x3d8] sm:$0xff] }
  0x73   : > { %2593 = vmatmul.mubr.msk.bf16.gmra.mrb[8].mxu0 %vm1188_vm0, %v3060_v10  ;;  %2596 = vmatmul.mubr.msk.bf16.gmra.mrb[8].mxu1 %vm1188_vm0, %v3060_v10  ;;  %v2482_v14 = vcombine.high %v248_v8, %v264_v9  ;;  %v2481_v20 = vcombine.low %v248_v8, %v264_v9  ;;  %v251_v9 = vld [vmem:[#allocation2 + $0x60] sm:$0xff] }
  0x74   : > { %1352 = vmatprep.mubr.bf16.mxu0 %v2879_v0  ;;  %1413 = vmatprep.mubr.bf16.mxu1 %v2879_v0 }
  0x7b   : > { %2597 = vmatmul.mubr.msk.bf16.vlgmr.msra.gmra.mrb[12].mxu0 %vm1188_vm0, %v3042_v41  ;;  %2600 = vmatmul.mubr.msk.bf16.vlgmr.msra.gmra.mrb[12].mxu1 %vm1188_vm0, %v3042_v41 }
  0x7c   : > { %1443 = vmatpush1.bf16.msra.mxu0 %v2471_v15  ;;  %1504 = vmatpush1.bf16.msra.mxu1 %v2473_v16  ;;  %v279_v15 = vld [vmem:[#allocation2 + $0x140] sm:$0xff] }
  0x7d   : > { %1444 = vmatprep.subr.bf16.mxu0 %v2504_v17  ;;  %1505 = vmatprep.subr.bf16.mxu1 %v2506_v18  ;;  %v295_v16 = vld [vmem:[#allocation2 + $0x1c0] sm:$0xff]  ;;  %v280_v17 = vld [vmem:[#allocation2 + $0x148] sm:$0xff] }
  0x7e   : > { %1362 = vmatprep.mubr.bf16.mxu0 %v2879_v0  ;;  %1423 = vmatprep.mubr.bf16.mxu1 %v2879_v0  ;;  %v296_v18 = vld [vmem:[#allocation2 + $0x1c8] sm:$0xff]  ;;  %v2512_v21 = vcombine.high %v279_v15, %v295_v16  ;;  %v2511_v27 = vcombine.low %v279_v15, %v295_v16  ;;  %v2581_v16 = vcombine.low %v346_v5, %v362_v6 }
  0x7f   : > { %v2514_v22 = vcombine.high %v280_v17, %v296_v18  ;;  %v2513_v28 = vcombine.low %v280_v17, %v296_v18 }
  0x80   : > { %1445 = vmatpush1.bf16.msra.mxu0 %v2503_v23  ;;  %1506 = vmatpush1.bf16.msra.mxu1 %v2505_v24  ;;  %v311_v23 = vld [vmem:[#allocation2 + $0x240] sm:$0xff] }
  0x81   : > { %1446 = vmatprep.subr.bf16.mxu0 %v2536_v25  ;;  %1507 = vmatprep.subr.bf16.mxu1 %v2538_v26  ;;  %v327_v24 = vld [vmem:[#allocation2 + $0x2c0] sm:$0xff]  ;;  %v312_v25 = vld [vmem:[#allocation2 + $0x248] sm:$0xff] }
  0x82   : > { %v328_v26 = vld [vmem:[#allocation2 + $0x2c8] sm:$0xff] }
  0x83   : > { %2598 = vmatmul.mubr.msk.bf16.gmra.mrb[16].mxu0 %vm1188_vm0, %v3051_v56  ;;  %2601 = vmatmul.mubr.msk.bf16.gmra.mrb[16].mxu1 %vm1188_vm0, %v3051_v56  ;;  %v2546_v30 = vcombine.high %v312_v25, %v328_v26 }
  0x84   : > { %1447 = vmatpush1.bf16.msra.mxu0 %v2535_v29  ;;  %1508 = vmatpush1.bf16.msra.mxu1 %v2537_v32  ;;  %v2544_v29 = vcombine.high %v311_v23, %v327_v24  ;;  %v359_v32 = vld [vmem:[#allocation2 + $0x3c0] sm:$0xff] }
  0x85   : > { %1372 = vmatprep.mubr.bf16.mxu0 %v2879_v0  ;;  %1433 = vmatprep.mubr.bf16.mxu1 %v2879_v0  ;;  %v2576_v37 = vcombine.high %v343_v31, %v359_v32  ;;  %v2575_v44 = vcombine.low %v343_v31, %v359_v32 }
  0x86   : > { %1448 = vmatprep.subr.bf16.mxu0 %v2568_v33  ;;  %1509 = vmatprep.subr.bf16.mxu1 %v2570_v36  ;;  %v2543_v33 = vcombine.low %v311_v23, %v327_v24  ;;  %v2545_v36 = vcombine.low %v312_v25, %v328_v26 }
  0x88   : > { %1449 = vmatpush1.bf16.msra.mxu0 %v2567_v39  ;;  %1510 = vmatpush1.bf16.msra.mxu1 %v2569_v40  ;;  %v265_v39 = vld [vmem:[#allocation2 + $0xd0] sm:$0xff]  ;;  %v2578_v40 = vcombine.high %v344_v34, %v360_v35  ;;  %v347_v35 = vld [vmem:[#allocation2 + $0x360] sm:$0xff] }
  0x89   : > { %1564 = vmatprep.subr.bf16.mxu0 %v2476_v42  ;;  %1625 = vmatprep.subr.bf16.mxu1 %v2478_v43  ;;  %v250_v42 = vld [vmem:[#allocation2 + $0x58] sm:$0xff]  ;;  %v2484_v46 = vcombine.high %v249_v38, %v265_v39  ;;  %v2483_v52 = vcombine.low %v249_v38, %v265_v39  ;;  %v348_v38 = vld [vmem:[#allocation2 + $0x368] sm:$0xff] }
  0x8a   : > { %v266_v43 = vld [vmem:[#allocation2 + $0xd8] sm:$0xff]  ;;  %v364_v39 = vld [vmem:[#allocation2 + $0x3e8] sm:$0xff] }
  0x8b   : > { %2599 = vmatmul.mubr.msk.bf16.gmra.mrb[20].mxu0 %vm1188_vm0, %v3060_v10  ;;  %2602 = vmatmul.mubr.msk.bf16.gmra.mrb[20].mxu1 %vm1188_vm0, %v3060_v10  ;;  %v2486_v47 = vcombine.high %v250_v42, %v266_v43  ;;  %v2485_v53 = vcombine.low %v250_v42, %v266_v43  ;;  %v253_v43 = vld [vmem:[#allocation2 + $0x70] sm:$0xff] }
  0x8c   : > { %1474 = vmatprep.mubr.bf16.mxu0 %v2879_v0  ;;  %1535 = vmatprep.mubr.bf16.mxu1 %v2879_v0 }
  0x93   : > { %2603 = vmatmul.mubr.msk.bf16.vlgmr.msra.gmra.mrb[24].mxu0 %vm1188_vm0, %v3042_v41  ;;  %2606 = vmatmul.mubr.msk.bf16.vlgmr.msra.gmra.mrb[24].mxu1 %vm1188_vm0, %v3042_v41 }
  0x94   : > { %1565 = vmatpush1.bf16.msra.mxu0 %v2475_v48  ;;  %1626 = vmatpush1.bf16.msra.mxu1 %v2477_v49  ;;  %v281_v48 = vld [vmem:[#allocation2 + $0x150] sm:$0xff] }
  0x95   : > { %1566 = vmatprep.subr.bf16.mxu0 %v2508_v50  ;;  %1627 = vmatprep.subr.bf16.mxu1 %v2510_v51  ;;  %v297_v49 = vld [vmem:[#allocation2 + $0x1d0] sm:$0xff]  ;;  %v282_v50 = vld [vmem:[#allocation2 + $0x158] sm:$0xff] }
  0x96   : > { %1484 = vmatprep.mubr.bf16.mxu0 %v2879_v0  ;;  %1545 = vmatprep.mubr.bf16.mxu1 %v2879_v0  ;;  %v298_v51 = vld [vmem:[#allocation2 + $0x1d8] sm:$0xff]  ;;  %v2516_v54 = vcombine.high %v281_v48, %v297_v49  ;;  %v2515_v61 = vcombine.low %v281_v48, %v297_v49  ;;  %v2585_v49 = vcombine.low %v348_v38, %v364_v39 }
  0x97   : > { %v2518_v55 = vcombine.high %v282_v50, %v298_v51  ;;  %v2517_v62 = vcombine.low %v282_v50, %v298_v51 }
  0x98   : > { %1567 = vmatpush1.bf16.msra.mxu0 %v2507_v57  ;;  %1628 = vmatpush1.bf16.msra.mxu1 %v2509_v58  ;;  %v313_v57 = vld [vmem:[#allocation2 + $0x250] sm:$0xff] }
  0x99   : > { %1568 = vmatprep.subr.bf16.mxu0 %v2540_v59  ;;  %1629 = vmatprep.subr.bf16.mxu1 %v2542_v60  ;;  %v329_v58 = vld [vmem:[#allocation2 + $0x2d0] sm:$0xff]  ;;  %v314_v59 = vld [vmem:[#allocation2 + $0x258] sm:$0xff] }
  0x9a   : > { %v330_v60 = vld [vmem:[#allocation2 + $0x2d8] sm:$0xff] }
  0x9b   : > { %2604 = vmatmul.mubr.msk.bf16.gmra.mrb[28].mxu0 %vm1188_vm0, %v3051_v56  ;;  %2607 = vmatmul.mubr.msk.bf16.gmra.mrb[28].mxu1 %vm1188_vm0, %v3051_v56  ;;  %v2550_v1 = vcombine.high %v314_v59, %v330_v60 }
  0x9c   : > { %1569 = vmatpush1.bf16.msra.mxu0 %v2539_v63  ;;  %1630 = vmatpush1.bf16.msra.mxu1 %v2541_v3  ;;  %v2548_v63 = vcombine.high %v313_v57, %v329_v58  ;;  %v361_v3 = vld [vmem:[#allocation2 + $0x3d0] sm:$0xff] }
  0x9d   : > { %1494 = vmatprep.mubr.bf16.mxu0 %v2879_v0  ;;  %1555 = vmatprep.mubr.bf16.mxu1 %v2879_v0  ;;  %v2580_v8 = vcombine.high %v345_v2, %v361_v3  ;;  %v2579_v15 = vcombine.low %v345_v2, %v361_v3 }
  0x9e   : > { %1570 = vmatprep.subr.bf16.mxu0 %v2572_v4  ;;  %1631 = vmatprep.subr.bf16.mxu1 %v2574_v7  ;;  %v2547_v4 = vcombine.low %v313_v57, %v329_v58  ;;  %v2549_v7 = vcombine.low %v314_v59, %v330_v60 }
  0xa0   : > { %1571 = vmatpush1.bf16.msra.mxu0 %v2571_v11  ;;  %1632 = vmatpush1.bf16.msra.mxu1 %v2573_v12  ;;  %v267_v11 = vld [vmem:[#allocation2 + $0xe0] sm:$0xff]  ;;  %v2582_v12 = vcombine.high %v346_v5, %v362_v6  ;;  %v349_v6 = vld [vmem:[#allocation2 + $0x370] sm:$0xff] }
  0xa1   : > { %1686 = vmatprep.subr.bf16.mxu0 %v2480_v13  ;;  %1747 = vmatprep.subr.bf16.mxu1 %v2482_v14  ;;  %v252_v13 = vld [vmem:[#allocation2 + $0x68] sm:$0xff]  ;;  %v2488_v17 = vcombine.high %v251_v9, %v267_v11  ;;  %v2487_v23 = vcombine.low %v251_v9, %v267_v11  ;;  %v350_v9 = vld [vmem:[#allocation2 + $0x378] sm:$0xff] }
  0xa2   : > { %v268_v14 = vld [vmem:[#allocation2 + $0xe8] sm:$0xff]  ;;  %v366_v11 = vld [vmem:[#allocation2 + $0x3f8] sm:$0xff] }
  0xa3   : > { %2605 = vmatmul.mubr.msk.bf16.gmra.mrb[32].mxu0 %vm1188_vm0, %v3060_v10  ;;  %2608 = vmatmul.mubr.msk.bf16.gmra.mrb[32].mxu1 %vm1188_vm0, %v3060_v10  ;;  %v2490_v18 = vcombine.high %v252_v13, %v268_v14  ;;  %v2489_v24 = vcombine.low %v252_v13, %v268_v14  ;;  %v2590_v14 = vcombine.high %v350_v9, %v366_v11 }
  0xa4   : > { %1596 = vmatprep.mubr.bf16.mxu0 %v2879_v0  ;;  %1657 = vmatprep.mubr.bf16.mxu1 %v2879_v0 }
  0xab   : > { %2609 = vmatmul.mubr.msk.bf16.vlgmr.msra.gmra.mrb[36].mxu0 %vm1188_vm0, %v3042_v41  ;;  %2612 = vmatmul.mubr.msk.bf16.vlgmr.msra.gmra.mrb[36].mxu1 %vm1188_vm0, %v3042_v41 }
  0xac   : > { %1687 = vmatpush1.bf16.msra.mxu0 %v2479_v19  ;;  %1748 = vmatpush1.bf16.msra.mxu1 %v2481_v20  ;;  %v283_v19 = vld [vmem:[#allocation2 + $0x160] sm:$0xff] }
  0xad   : > { %1688 = vmatprep.subr.bf16.mxu0 %v2512_v21  ;;  %1749 = vmatprep.subr.bf16.mxu1 %v2514_v22  ;;  %v299_v20 = vld [vmem:[#allocation2 + $0x1e0] sm:$0xff]  ;;  %v284_v21 = vld [vmem:[#allocation2 + $0x168] sm:$0xff] }
  0xae   : > { %1606 = vmatprep.mubr.bf16.mxu0 %v2879_v0  ;;  %1667 = vmatprep.mubr.bf16.mxu1 %v2879_v0  ;;  %v300_v22 = vld [vmem:[#allocation2 + $0x1e8] sm:$0xff]  ;;  %v2520_v25 = vcombine.high %v283_v19, %v299_v20  ;;  %v2519_v31 = vcombine.low %v283_v19, %v299_v20  ;;  %v3198_v19 = vld [vmem:[#allocation5] sm:$0xff] }
  0xaf   : > { %v2522_v26 = vcombine.high %v284_v21, %v300_v22  ;;  %v2521_v32 = vcombine.low %v284_v21, %v300_v22 }
  0xb0   : > { %1689 = vmatpush1.bf16.msra.mxu0 %v2511_v27  ;;  %1750 = vmatpush1.bf16.msra.mxu1 %v2513_v28  ;;  %v315_v27 = vld [vmem:[#allocation2 + $0x260] sm:$0xff] }
  0xb1   : > { %1690 = vmatprep.subr.bf16.mxu0 %v2544_v29  ;;  %1751 = vmatprep.subr.bf16.mxu1 %v2546_v30  ;;  %v331_v28 = vld [vmem:[#allocation2 + $0x2e0] sm:$0xff]  ;;  %v316_v29 = vld [vmem:[#allocation2 + $0x268] sm:$0xff] }
  0xb2   : > { %v332_v30 = vld [vmem:[#allocation2 + $0x2e8] sm:$0xff] }
  0xb3   : > { %2610 = vmatmul.mubr.msk.bf16.gmra.mrb[40].mxu0 %vm1188_vm0, %v3051_v56  ;;  %2613 = vmatmul.mubr.msk.bf16.gmra.mrb[40].mxu1 %vm1188_vm0, %v3051_v56  ;;  %v2554_v34 = vcombine.high %v316_v29, %v332_v30 }
  0xb4   : > { %1691 = vmatpush1.bf16.msra.mxu0 %v2543_v33  ;;  %1752 = vmatpush1.bf16.msra.mxu1 %v2545_v36  ;;  %v2552_v33 = vcombine.high %v315_v27, %v331_v28  ;;  %v363_v36 = vld [vmem:[#allocation2 + $0x3e0] sm:$0xff] }
  0xb5   : > { %1616 = vmatprep.mubr.bf16.mxu0 %v2879_v0  ;;  %1677 = vmatprep.mubr.bf16.mxu1 %v2879_v0  ;;  %v2584_v42 = vcombine.high %v347_v35, %v363_v36  ;;  %v2583_v48 = vcombine.low %v347_v35, %v363_v36 }
  0xb6   : > { %1692 = vmatprep.subr.bf16.mxu0 %v2576_v37  ;;  %1753 = vmatprep.subr.bf16.mxu1 %v2578_v40  ;;  %v2551_v37 = vcombine.low %v315_v27, %v331_v28  ;;  %v2553_v40 = vcombine.low %v316_v29, %v332_v30 }
  0xb8   : > { %1693 = vmatpush1.bf16.msra.mxu0 %v2575_v44  ;;  %1754 = vmatpush1.bf16.msra.mxu1 %v2577_v45  ;;  %v269_v44 = vld [vmem:[#allocation2 + $0xf0] sm:$0xff]  ;;  %v2586_v45 = vcombine.high %v348_v38, %v364_v39 }
  0xb9   : > { %1808 = vmatprep.subr.bf16.mxu0 %v2484_v46  ;;  %1869 = vmatprep.subr.bf16.mxu1 %v2486_v47  ;;  %v254_v46 = vld [vmem:[#allocation2 + $0x78] sm:$0xff]  ;;  %v2492_v50 = vcombine.high %v253_v43, %v269_v44  ;;  %v2491_v57 = vcombine.low %v253_v43, %v269_v44 }
  0xba   : > { %v270_v47 = vld [vmem:[#allocation2 + $0xf8] sm:$0xff] }
  0xbb   : > { %2611 = vmatmul.mubr.msk.bf16.gmra.mrb[44].mxu0 %vm1188_vm0, %v3060_v10  ;;  %2614 = vmatmul.mubr.msk.bf16.gmra.mrb[44].mxu1 %vm1188_vm0, %v3060_v10  ;;  %v2494_v51 = vcombine.high %v254_v46, %v270_v47  ;;  %v2493_v58 = vcombine.low %v254_v46, %v270_v47 }
  0xbc   : > { %1718 = vmatprep.mubr.bf16.mxu0 %v2879_v0  ;;  %1779 = vmatprep.mubr.bf16.mxu1 %v2879_v0 }
  0xc3   : > { %2615 = vmatmul.mubr.msk.bf16.vlgmr.msra.gmra.mrb[48].mxu0 %vm1188_vm0, %v3042_v41  ;;  %2618 = vmatmul.mubr.msk.bf16.vlgmr.msra.gmra.mrb[48].mxu1 %vm1188_vm0, %v3042_v41 }
  0xc4   : > { %1809 = vmatpush1.bf16.msra.mxu0 %v2483_v52  ;;  %1870 = vmatpush1.bf16.msra.mxu1 %v2485_v53  ;;  %v285_v52 = vld [vmem:[#allocation2 + $0x170] sm:$0xff] }
  0xc5   : > { %1810 = vmatprep.subr.bf16.mxu0 %v2516_v54  ;;  %1871 = vmatprep.subr.bf16.mxu1 %v2518_v55  ;;  %v301_v53 = vld [vmem:[#allocation2 + $0x1f0] sm:$0xff]  ;;  %v286_v54 = vld [vmem:[#allocation2 + $0x178] sm:$0xff] }
  0xc6   : > { %1728 = vmatprep.mubr.bf16.mxu0 %v2879_v0  ;;  %1789 = vmatprep.mubr.bf16.mxu1 %v2879_v0  ;;  %v302_v55 = vld [vmem:[#allocation2 + $0x1f8] sm:$0xff]  ;;  %v2524_v59 = vcombine.high %v285_v52, %v301_v53  ;;  %v2523_v2 = vcombine.low %v285_v52, %v301_v53 }
  0xc7   : > { %v2526_v60 = vcombine.high %v286_v54, %v302_v55  ;;  %v2525_v3 = vcombine.low %v286_v54, %v302_v55 }
  0xc8   : > { %1811 = vmatpush1.bf16.msra.mxu0 %v2515_v61  ;;  %1872 = vmatpush1.bf16.msra.mxu1 %v2517_v62  ;;  %v317_v61 = vld [vmem:[#allocation2 + $0x270] sm:$0xff] }
  0xc9   : > { %1812 = vmatprep.subr.bf16.mxu0 %v2548_v63  ;;  %1873 = vmatprep.subr.bf16.mxu1 %v2550_v1  ;;  %v333_v62 = vld [vmem:[#allocation2 + $0x2f0] sm:$0xff]  ;;  %v318_v63 = vld [vmem:[#allocation2 + $0x278] sm:$0xff] }
  0xca   : > { %v334_v1 = vld [vmem:[#allocation2 + $0x2f8] sm:$0xff] }
  0xcb   : > { %2616 = vmatmul.mubr.msk.bf16.gmra.mrb[52].mxu0 %vm1188_vm0, %v3051_v56  ;;  %2619 = vmatmul.mubr.msk.bf16.gmra.mrb[52].mxu1 %vm1188_vm0, %v3051_v56  ;;  %v2558_v5 = vcombine.high %v318_v63, %v334_v1 }
  0xcc   : > { %1813 = vmatpush1.bf16.msra.mxu0 %v2547_v4  ;;  %1874 = vmatpush1.bf16.msra.mxu1 %v2549_v7  ;;  %v2556_v4 = vcombine.high %v317_v61, %v333_v62  ;;  %v365_v7 = vld [vmem:[#allocation2 + $0x3f0] sm:$0xff] }
  0xcd   : > { %1738 = vmatprep.mubr.bf16.mxu0 %v2879_v0  ;;  %1799 = vmatprep.mubr.bf16.mxu1 %v2879_v0  ;;  %v2588_v13 = vcombine.high %v349_v6, %v365_v7 }
  0xce   : > { %1814 = vmatprep.subr.bf16.mxu0 %v2580_v8  ;;  %1875 = vmatprep.subr.bf16.mxu1 %v2582_v12  ;;  %v2555_v8 = vcombine.low %v317_v61, %v333_v62  ;;  %v2557_v12 = vcombine.low %v318_v63, %v334_v1 }
  0xd0   : > { %1815 = vmatpush1.bf16.msra.mxu0 %v2579_v15  ;;  %1876 = vmatpush1.bf16.msra.mxu1 %v2581_v16  ;;  %v2587_v15 = vcombine.low %v349_v6, %v365_v7  ;;  %v2589_v16 = vcombine.low %v350_v9, %v366_v11 }
  0xd1   : > { %1930 = vmatprep.subr.bf16.mxu0 %v2488_v17  ;;  %1991 = vmatprep.subr.bf16.mxu1 %v2490_v18 }
  0xd3   : > { %2617 = vmatmul.mubr.msk.bf16.gmra.mrb[56].mxu0 %vm1188_vm0, %v3060_v10  ;;  %2620 = vmatmul.mubr.msk.bf16.gmra.mrb[56].mxu1 %vm1188_vm0, %v3060_v10 }
  0xd4   : > { %1840 = vmatprep.mubr.bf16.mxu0 %v2879_v0  ;;  %1901 = vmatprep.mubr.bf16.mxu1 %v2879_v0 }
  0xdb   : > { %2621 = vmatmul.mubr.msk.bf16.vlgmr.msra.gmra.mrb[60].mxu0 %vm1188_vm0, %v3042_v41  ;;  %2624 = vmatmul.mubr.msk.bf16.vlgmr.msra.gmra.mrb[60].mxu1 %vm1188_vm0, %v3042_v41 }
  0xdc   : > { %1931 = vmatpush1.bf16.msra.mxu0 %v2487_v23  ;;  %1992 = vmatpush1.bf16.msra.mxu1 %v2489_v24 }
  0xdd   : > { %1932 = vmatprep.subr.bf16.mxu0 %v2520_v25  ;;  %1993 = vmatprep.subr.bf16.mxu1 %v2522_v26 }
  0xde   : > { %1850 = vmatprep.mubr.bf16.mxu0 %v2879_v0  ;;  %1911 = vmatprep.mubr.bf16.mxu1 %v2879_v0 }
  0xe0   : > { %1933 = vmatpush1.bf16.msra.mxu0 %v2519_v31  ;;  %1994 = vmatpush1.bf16.msra.mxu1 %v2521_v32 }
  0xe1   : > { %1934 = vmatprep.subr.bf16.mxu0 %v2552_v33  ;;  %1995 = vmatprep.subr.bf16.mxu1 %v2554_v34 }
  0xe3   : > { %2622 = vmatmul.mubr.msk.bf16.gmra.mrb[64].mxu0 %vm1188_vm0, %v3051_v56  ;;  %2625 = vmatmul.mubr.msk.bf16.gmra.mrb[64].mxu1 %vm1188_vm0, %v3051_v56 }
  0xe4   : > { %1935 = vmatpush1.bf16.msra.mxu0 %v2551_v37  ;;  %1996 = vmatpush1.bf16.msra.mxu1 %v2553_v40 }
  0xe5   : > { %1860 = vmatprep.mubr.bf16.mxu0 %v2879_v0  ;;  %1921 = vmatprep.mubr.bf16.mxu1 %v2879_v0 }
  0xe6   : > { %1936 = vmatprep.subr.bf16.mxu0 %v2584_v42  ;;  %1997 = vmatprep.subr.bf16.mxu1 %v2586_v45 }
  0xe8   : > { %1937 = vmatpush1.bf16.msra.mxu0 %v2583_v48  ;;  %1998 = vmatpush1.bf16.msra.mxu1 %v2585_v49 }
  0xe9   : > { %2052 = vmatprep.subr.bf16.mxu0 %v2492_v50  ;;  %2113 = vmatprep.subr.bf16.mxu1 %v2494_v51 }
  0xeb   : > { %2623 = vmatmul.mubr.msk.bf16.gmra.mrb[68].mxu0 %vm1188_vm0, %v3060_v10  ;;  %2626 = vmatmul.mubr.msk.bf16.gmra.mrb[68].mxu1 %vm1188_vm0, %v3060_v10 }
  0xec   : > { %1962 = vmatprep.mubr.bf16.mxu0 %v2879_v0  ;;  %2023 = vmatprep.mubr.bf16.mxu1 %v2879_v0 }
  0xf3   : > { %2627 = vmatmul.mubr.msk.bf16.vlgmr.msra.gmra.mrb[72].mxu0 %vm1188_vm0, %v3042_v41  ;;  %2630 = vmatmul.mubr.msk.bf16.vlgmr.msra.gmra.mrb[72].mxu1 %vm1188_vm0, %v3042_v41 }
  0xf4   : > { %2053 = vmatpush1.bf16.msra.mxu0 %v2491_v57  ;;  %2114 = vmatpush1.bf16.msra.mxu1 %v2493_v58 }
  0xf5   : > { %2054 = vmatprep.subr.bf16.mxu0 %v2524_v59  ;;  %2115 = vmatprep.subr.bf16.mxu1 %v2526_v60 }
  0xf6   : > { %1972 = vmatprep.mubr.bf16.mxu0 %v2879_v0  ;;  %2033 = vmatprep.mubr.bf16.mxu1 %v2879_v0 }
  0xf8   : > { %2055 = vmatpush1.bf16.msra.mxu0 %v2523_v2  ;;  %2116 = vmatpush1.bf16.msra.mxu1 %v2525_v3 }
  0xf9   : > { %2056 = vmatprep.subr.bf16.mxu0 %v2556_v4  ;;  %2117 = vmatprep.subr.bf16.mxu1 %v2558_v5 }
  0xfb   : > { %2628 = vmatmul.mubr.msk.bf16.gmra.mrb[76].mxu0 %vm1188_vm0, %v3051_v56  ;;  %2631 = vmatmul.mubr.msk.bf16.gmra.mrb[76].mxu1 %vm1188_vm0, %v3051_v56 }
  0xfc   : > { %2057 = vmatpush1.bf16.msra.mxu0 %v2555_v8  ;;  %2118 = vmatpush1.bf16.msra.mxu1 %v2557_v12 }
  0xfd   : > { %1982 = vmatprep.mubr.bf16.mxu0 %v2879_v0  ;;  %2043 = vmatprep.mubr.bf16.mxu1 %v2879_v0 }
  0xfe   : > { %2058 = vmatprep.subr.bf16.mxu0 %v2588_v13  ;;  %2119 = vmatprep.subr.bf16.mxu1 %v2590_v14 }
 0x100   : > { %2059 = vmatpush1.bf16.msra.mxu0 %v2587_v15  ;;  %2120 = vmatpush1.bf16.msra.mxu1 %v2589_v16 }
 0x103   : > { %2629 = vmatmul.mubr.msk.bf16.gmra.mrb[80].mxu0 %vm1188_vm0, %v3060_v10  ;;  %2632 = vmatmul.mubr.msk.bf16.gmra.mrb[80].mxu1 %vm1188_vm0, %v3060_v10 }
 0x104   : > { %2084 = vmatprep.mubr.bf16.mxu0 %v2879_v0  ;;  %2145 = vmatprep.mubr.bf16.mxu1 %v2879_v0 }
 0x10b   : > { %2633 = vmatmul.mubr.msk.bf16.vlgmr.msra.gmra.mrb[84].mxu0 %vm1188_vm0, %v3042_v41  ;;  %2636 = vmatmul.mubr.msk.bf16.vlgmr.msra.gmra.mrb[84].mxu1 %vm1188_vm0, %v3042_v41  ;;  %v375_v41 = vlaneseq }
 0x10c   : > { %2094 = vmatprep.mubr.bf16.mxu0 %v2879_v0  ;;  %2155 = vmatprep.mubr.bf16.mxu1 %v2879_v0 }
 0x10d   : > { %v3192_v17 = vshrl.u32 %v375_v41, 7 }
 0x10f   : > { %v3196_v18 = vsub.s32 0, %v3192_v17  ;;  %v3207_v20 = vsub.s32 3, %v3192_v17  ;;  %v3238_v62 = vsub.s32 4, %v3192_v17  ;;  %v3241_v4 = vsub.s32 6, %v3192_v17 }
 0x110   : > { %v3244_v5 = vsub.s32 5, %v3192_v17  ;;  %v3248_v9 = vsub.s32 7, %v3192_v17 }
 0x111   : > { %v390_v23 = vrot.slane %v3198_v19, %v3207_v20  ;;  %v394_v12 = vrot.slane %v3198_v19, %v3238_v62  ;;  %v402_v13 = vrot.slane %v3198_v19, %v3241_v4 }
 0x112   : > { %v398_v14 = vrot.slane %v3198_v19, %v3244_v5  ;;  %v406_v15 = vrot.slane %v3198_v19, %v3248_v9 }
 0x113   : > { %2634 = vmatmul.mubr.msk.bf16.gmra.mrb[88].mxu0 %vm1188_vm0, %v3051_v56  ;;  %2637 = vmatmul.mubr.msk.bf16.gmra.mrb[88].mxu1 %vm1188_vm0, %v3051_v56  ;;  %v3201_v56 = vsub.s32 2, %v3192_v17 }
 0x114   : > { %2104 = vmatprep.mubr.bf16.mxu0 %v2879_v0  ;;  %2165 = vmatprep.mubr.bf16.mxu1 %v2879_v0  ;;  %v3204_v0 = vsub.s32 1, %v3192_v17 }
 0x115   : > { %v386_v21 = vrot.slane %v3198_v19, %v3201_v56 }
 0x116   : > { %v382_v22 = vrot.slane %v3198_v19, %v3204_v0 }
 0x11b   : > { %2635 = vmatmul.mubr.msk.bf16.gmra.mrb[92].mxu0 %vm1188_vm0, %v3060_v10  ;;  %2638 = vmatmul.mubr.msk.bf16.gmra.mrb[92].mxu1 %vm1188_vm0, %v3060_v10  ;;  %v378_v10 = vrot.slane %v3198_v19, %v3196_v18 }
 0x136   : > { %v1232_v24 = vpop.f32.mrb[0].mxu0  ;;  %v1293_v26 = vpop.f32.mrb[0].mxu1 }
 0x137   : > { %v1233_v25 = vadd.f32 %v1232_v24, %v378_v10  ;;  %v1234_v27 = vpop.f32.mrb[1].mxu0  ;;  %v1294_v28 = vadd.f32 %v1293_v26, %v386_v21  ;;  %v1295_v30 = vpop.f32.mrb[1].mxu1 }
 0x138   : > { %v1235_v29 = vadd.f32 %v1234_v27, %v382_v22  ;;  %v1236_v31 = vpop.f32.mrb[2].mxu0  ;;  %v1296_v32 = vadd.f32 %v1295_v30, %v390_v23  ;;  %v1297_v34 = vpop.f32.mrb[2].mxu1 }
 0x139   : > { %2174 = vst [vmem:[%s3219_s6] sm:$0xff] %v1233_v25  ;;  %v1237_v33 = vadd.f32 %v1236_v31, %v378_v10  ;;  %v1238_v35 = vpop.f32.mrb[3].mxu0  ;;  %2176 = vst [vmem:[%s3219_s6 + $0x10] sm:$0xff] %v1294_v28  ;;  %v1298_v36 = vadd.f32 %v1297_v34, %v386_v21  ;;  %v1299_v38 = vpop.f32.mrb[3].mxu1 }
 0x13a   : > { %2175 = vst [vmem:[%s3219_s6 + $0x8] sm:$0xff] %v1235_v29  ;;  %v1239_v37 = vadd.f32 %v1238_v35, %v382_v22  ;;  %2177 = vst [vmem:[%s3219_s6 + $0x18] sm:$0xff] %v1296_v32  ;;  %v1300_v39 = vadd.f32 %v1299_v38, %v390_v23 }
 0x13b   : > { %2206 = vst [vmem:[%s3219_s6 + $0x100] sm:$0xff] %v1237_v33  ;;  %2208 = vst [vmem:[%s3219_s6 + $0x110] sm:$0xff] %v1298_v36 }
 0x13c   : > { %2207 = vst [vmem:[%s3219_s6 + $0x108] sm:$0xff] %v1239_v37  ;;  %2209 = vst [vmem:[%s3219_s6 + $0x118] sm:$0xff] %v1300_v39 }
 0x13e   : > { %v1242_v40 = vpop.f32.mrb[4].mxu0  ;;  %v1303_v43 = vpop.f32.mrb[4].mxu1 }
 0x13f   : > { %v1243_v42 = vadd.f32 %v1242_v40, %v378_v10  ;;  %v1244_v44 = vpop.f32.mrb[5].mxu0  ;;  %v1304_v45 = vadd.f32 %v1303_v43, %v386_v21  ;;  %v1305_v47 = vpop.f32.mrb[5].mxu1 }
 0x140   : > { %v1245_v46 = vadd.f32 %v1244_v44, %v382_v22  ;;  %v1246_v48 = vpop.f32.mrb[6].mxu0  ;;  %v1306_v49 = vadd.f32 %v1305_v47, %v390_v23  ;;  %v1307_v51 = vpop.f32.mrb[6].mxu1 }
 0x141   : > { %2238 = vst [vmem:[%s3219_s6 + $0x200] sm:$0xff] %v1243_v42  ;;  %v1247_v50 = vadd.f32 %v1246_v48, %v378_v10  ;;  %v1248_v52 = vpop.f32.mrb[7].mxu0  ;;  %2240 = vst [vmem:[%s3219_s6 + $0x210] sm:$0xff] %v1304_v45  ;;  %v1308_v53 = vadd.f32 %v1307_v51, %v386_v21  ;;  %v1309_v55 = vpop.f32.mrb[7].mxu1 }
 0x142   : > { %2239 = vst [vmem:[%s3219_s6 + $0x208] sm:$0xff] %v1245_v46  ;;  %v1249_v54 = vadd.f32 %v1248_v52, %v382_v22  ;;  %2241 = vst [vmem:[%s3219_s6 + $0x218] sm:$0xff] %v1306_v49  ;;  %v1310_v57 = vadd.f32 %v1309_v55, %v390_v23 }
 0x143   : > { %2270 = vst [vmem:[%s3219_s6 + $0x300] sm:$0xff] %v1247_v50  ;;  %2272 = vst [vmem:[%s3219_s6 + $0x310] sm:$0xff] %v1308_v53 }
 0x144   : > { %2271 = vst [vmem:[%s3219_s6 + $0x308] sm:$0xff] %v1249_v54  ;;  %2273 = vst [vmem:[%s3219_s6 + $0x318] sm:$0xff] %v1310_v57 }
 0x146   : > { %v1252_v58 = vpop.f32.mrb[8].mxu0  ;;  %v1313_v60 = vpop.f32.mrb[8].mxu1 }
 0x147   : > { %v1253_v59 = vadd.f32 %v1252_v58, %v378_v10  ;;  %v1254_v61 = vpop.f32.mrb[9].mxu0  ;;  %v1314_v63 = vadd.f32 %v1313_v60, %v386_v21  ;;  %v1315_v2 = vpop.f32.mrb[9].mxu1  ;;  %v3277_v58 = vld [vmem:[#allocation5 + $0x8] sm:$0xff] }
 0x148   : > { %v1255_v1 = vadd.f32 %v1254_v61, %v382_v22  ;;  %v1256_v3 = vpop.f32.mrb[10].mxu0  ;;  %v1316_v6 = vadd.f32 %v1315_v2, %v390_v23  ;;  %v1317_v7 = vpop.f32.mrb[10].mxu1  ;;  %v418_v2 = vrot.slane %v3277_v58, %v3201_v56 }
 0x149   : > { %2302 = vst [vmem:[%s3219_s6 + $0x400] sm:$0xff] %v1253_v59  ;;  %v1257_v8 = vpop.f32.mrb[11].mxu0  ;;  %2304 = vst [vmem:[%s3219_s6 + $0x410] sm:$0xff] %v1314_v63  ;;  %v1318_v11 = vpop.f32.mrb[11].mxu1  ;;  %v414_v3 = vrot.slane %v3277_v58, %v3204_v0 }
 0x14a   : > { %2303 = vst [vmem:[%s3219_s6 + $0x408] sm:$0xff] %v1255_v1  ;;  %2305 = vst [vmem:[%s3219_s6 + $0x418] sm:$0xff] %v1316_v6  ;;  %v410_v1 = vrot.slane %v3277_v58, %v3196_v18  ;;  %v422_v6 = vrot.slane %v3277_v58, %v3207_v20 }
 0x14e   : > { %v1354_v16 = vpop.f32.mrb[12].mxu0  ;;  %v1415_v17 = vpop.f32.mrb[12].mxu1 }
 0x14f   : > { %v1355_v41 = vadd.f32 %v1354_v16, %v394_v12  ;;  %v1356_v10 = vpop.f32.mrb[13].mxu0  ;;  %v1416_v21 = vadd.f32 %v1415_v17, %v402_v13  ;;  %v1417_v23 = vpop.f32.mrb[13].mxu1 }
 0x150   : > { %v1357_v22 = vadd.f32 %v1356_v10, %v398_v14  ;;  %v1358_v24 = vpop.f32.mrb[14].mxu0  ;;  %v1418_v25 = vadd.f32 %v1417_v23, %v406_v15  ;;  %v1419_v27 = vpop.f32.mrb[14].mxu1 }
 0x151   : > { %2178 = vst [vmem:[%s3219_s6 + $0x20] sm:$0xff] %v1355_v41  ;;  %v1359_v26 = vadd.f32 %v1358_v24, %v394_v12  ;;  %v1360_v28 = vpop.f32.mrb[15].mxu0  ;;  %2180 = vst [vmem:[%s3219_s6 + $0x30] sm:$0xff] %v1416_v21  ;;  %v1420_v19 = vadd.f32 %v1419_v27, %v402_v13  ;;  %v1421_v30 = vpop.f32.mrb[15].mxu1 }
 0x152   : > { %2179 = vst [vmem:[%s3219_s6 + $0x28] sm:$0xff] %v1357_v22  ;;  %v1361_v29 = vadd.f32 %v1360_v28, %v398_v14  ;;  %2181 = vst [vmem:[%s3219_s6 + $0x38] sm:$0xff] %v1418_v25  ;;  %v1422_v31 = vadd.f32 %v1421_v30, %v406_v15 }
 0x153   : > { %2210 = vst [vmem:[%s3219_s6 + $0x120] sm:$0xff] %v1359_v26  ;;  %2212 = vst [vmem:[%s3219_s6 + $0x130] sm:$0xff] %v1420_v19 }
 0x154   : > { %2211 = vst [vmem:[%s3219_s6 + $0x128] sm:$0xff] %v1361_v29  ;;  %2213 = vst [vmem:[%s3219_s6 + $0x138] sm:$0xff] %v1422_v31 }
 0x156   : > { %v1364_v32 = vpop.f32.mrb[16].mxu0  ;;  %v1425_v34 = vpop.f32.mrb[16].mxu1 }
 0x157   : > { %v1365_v33 = vadd.f32 %v1364_v32, %v394_v12  ;;  %v1366_v35 = vpop.f32.mrb[17].mxu0  ;;  %v1426_v36 = vadd.f32 %v1425_v34, %v402_v13  ;;  %v1427_v38 = vpop.f32.mrb[17].mxu1 }
 0x158   : > { %v1367_v37 = vadd.f32 %v1366_v35, %v398_v14  ;;  %v1368_v39 = vpop.f32.mrb[18].mxu0  ;;  %v1428_v40 = vadd.f32 %v1427_v38, %v406_v15  ;;  %v1429_v43 = vpop.f32.mrb[18].mxu1 }
 0x159   : > { %2242 = vst [vmem:[%s3219_s6 + $0x220] sm:$0xff] %v1365_v33  ;;  %v1369_v42 = vadd.f32 %v1368_v39, %v394_v12  ;;  %v1370_v44 = vpop.f32.mrb[19].mxu0  ;;  %2244 = vst [vmem:[%s3219_s6 + $0x230] sm:$0xff] %v1426_v36  ;;  %v1430_v45 = vadd.f32 %v1429_v43, %v402_v13  ;;  %v1431_v47 = vpop.f32.mrb[19].mxu1 }
 0x15a   : > { %2243 = vst [vmem:[%s3219_s6 + $0x228] sm:$0xff] %v1367_v37  ;;  %v1371_v46 = vadd.f32 %v1370_v44, %v398_v14  ;;  %2245 = vst [vmem:[%s3219_s6 + $0x238] sm:$0xff] %v1428_v40  ;;  %v1432_v48 = vadd.f32 %v1431_v47, %v406_v15 }
 0x15b   : > { %2274 = vst [vmem:[%s3219_s6 + $0x320] sm:$0xff] %v1369_v42  ;;  %2276 = vst [vmem:[%s3219_s6 + $0x330] sm:$0xff] %v1430_v45 }
 0x15c   : > { %2275 = vst [vmem:[%s3219_s6 + $0x328] sm:$0xff] %v1371_v46  ;;  %2277 = vst [vmem:[%s3219_s6 + $0x338] sm:$0xff] %v1432_v48 }
 0x15e   : > { %v1374_v49 = vpop.f32.mrb[20].mxu0  ;;  %v1435_v51 = vpop.f32.mrb[20].mxu1 }
 0x15f   : > { %v1375_v50 = vadd.f32 %v1374_v49, %v394_v12  ;;  %v1376_v52 = vpop.f32.mrb[21].mxu0  ;;  %v1436_v53 = vadd.f32 %v1435_v51, %v402_v13  ;;  %v1437_v55 = vpop.f32.mrb[21].mxu1 }
 0x160   : > { %v1377_v54 = vadd.f32 %v1376_v52, %v398_v14  ;;  %v1378_v57 = vpop.f32.mrb[22].mxu0  ;;  %v1438_v59 = vadd.f32 %v1437_v55, %v406_v15  ;;  %v1439_v60 = vpop.f32.mrb[22].mxu1  ;;  %v434_v55 = vrot.slane %v3277_v58, %v3241_v4 }
 0x161   : > { %2306 = vst [vmem:[%s3219_s6 + $0x420] sm:$0xff] %v1375_v50  ;;  %v1379_v61 = vpop.f32.mrb[23].mxu0  ;;  %2308 = vst [vmem:[%s3219_s6 + $0x430] sm:$0xff] %v1436_v53  ;;  %v1440_v63 = vpop.f32.mrb[23].mxu1  ;;  %v430_v57 = vrot.slane %v3277_v58, %v3244_v5 }
 0x162   : > { %2307 = vst [vmem:[%s3219_s6 + $0x428] sm:$0xff] %v1377_v54  ;;  %2309 = vst [vmem:[%s3219_s6 + $0x438] sm:$0xff] %v1438_v59  ;;  %v426_v54 = vrot.slane %v3277_v58, %v3238_v62  ;;  %v438_v59 = vrot.slane %v3277_v58, %v3248_v9 }
 0x166   : > { %v1476_v7 = vpop.f32.mrb[24].mxu0  ;;  %v1537_v11 = vpop.f32.mrb[24].mxu1 }
 0x167   : > { %v1477_v8 = vadd.f32 %v1476_v7, %v410_v1  ;;  %v1478_v12 = vpop.f32.mrb[25].mxu0  ;;  %v1538_v13 = vadd.f32 %v1537_v11, %v418_v2  ;;  %v1539_v15 = vpop.f32.mrb[25].mxu1 }
 0x168   : > { %v1479_v14 = vadd.f32 %v1478_v12, %v414_v3  ;;  %v1480_v16 = vpop.f32.mrb[26].mxu0  ;;  %v1540_v41 = vadd.f32 %v1539_v15, %v422_v6  ;;  %v1541_v10 = vpop.f32.mrb[26].mxu1 }
 0x169   : > { %2182 = vst [vmem:[%s3219_s6 + $0x40] sm:$0xff] %v1477_v8  ;;  %v1481_v17 = vadd.f32 %v1480_v16, %v410_v1  ;;  %v1482_v21 = vpop.f32.mrb[27].mxu0  ;;  %2184 = vst [vmem:[%s3219_s6 + $0x50] sm:$0xff] %v1538_v13  ;;  %v1542_v22 = vadd.f32 %v1541_v10, %v418_v2  ;;  %v1543_v24 = vpop.f32.mrb[27].mxu1 }
 0x16a   : > { %2183 = vst [vmem:[%s3219_s6 + $0x48] sm:$0xff] %v1479_v14  ;;  %v1483_v23 = vadd.f32 %v1482_v21, %v414_v3  ;;  %2185 = vst [vmem:[%s3219_s6 + $0x58] sm:$0xff] %v1540_v41  ;;  %v1544_v25 = vadd.f32 %v1543_v24, %v422_v6 }
 0x16b   : > { %2214 = vst [vmem:[%s3219_s6 + $0x140] sm:$0xff] %v1481_v17  ;;  %2216 = vst [vmem:[%s3219_s6 + $0x150] sm:$0xff] %v1542_v22 }
 0x16c   : > { %2215 = vst [vmem:[%s3219_s6 + $0x148] sm:$0xff] %v1483_v23  ;;  %2217 = vst [vmem:[%s3219_s6 + $0x158] sm:$0xff] %v1544_v25 }
 0x16e   : > { %v1486_v26 = vpop.f32.mrb[28].mxu0  ;;  %v1547_v28 = vpop.f32.mrb[28].mxu1 }
 0x16f   : > { %v1487_v27 = vadd.f32 %v1486_v26, %v410_v1  ;;  %v1488_v19 = vpop.f32.mrb[29].mxu0  ;;  %v1548_v29 = vadd.f32 %v1547_v28, %v418_v2  ;;  %v1549_v31 = vpop.f32.mrb[29].mxu1 }
 0x170   : > { %v1489_v30 = vadd.f32 %v1488_v19, %v414_v3  ;;  %v1490_v32 = vpop.f32.mrb[30].mxu0  ;;  %v1550_v33 = vadd.f32 %v1549_v31, %v422_v6  ;;  %v1551_v35 = vpop.f32.mrb[30].mxu1 }
 0x171   : > { %2246 = vst [vmem:[%s3219_s6 + $0x240] sm:$0xff] %v1487_v27  ;;  %v1491_v34 = vadd.f32 %v1490_v32, %v410_v1  ;;  %v1492_v36 = vpop.f32.mrb[31].mxu0  ;;  %2248 = vst [vmem:[%s3219_s6 + $0x250] sm:$0xff] %v1548_v29  ;;  %v1552_v37 = vadd.f32 %v1551_v35, %v418_v2  ;;  %v1553_v39 = vpop.f32.mrb[31].mxu1 }
 0x172   : > { %2247 = vst [vmem:[%s3219_s6 + $0x248] sm:$0xff] %v1489_v30  ;;  %v1493_v38 = vadd.f32 %v1492_v36, %v414_v3  ;;  %2249 = vst [vmem:[%s3219_s6 + $0x258] sm:$0xff] %v1550_v33  ;;  %v1554_v40 = vadd.f32 %v1553_v39, %v422_v6 }
 0x173   : > { %2278 = vst [vmem:[%s3219_s6 + $0x340] sm:$0xff] %v1491_v34  ;;  %2280 = vst [vmem:[%s3219_s6 + $0x350] sm:$0xff] %v1552_v37 }
 0x174   : > { %2279 = vst [vmem:[%s3219_s6 + $0x348] sm:$0xff] %v1493_v38  ;;  %2281 = vst [vmem:[%s3219_s6 + $0x358] sm:$0xff] %v1554_v40 }
 0x176   : > { %v1496_v42 = vpop.f32.mrb[32].mxu0  ;;  %v1557_v44 = vpop.f32.mrb[32].mxu1 }
 0x177   : > { %v1497_v43 = vadd.f32 %v1496_v42, %v410_v1  ;;  %v1498_v45 = vpop.f32.mrb[33].mxu0  ;;  %v1558_v46 = vadd.f32 %v1557_v44, %v418_v2  ;;  %v1559_v48 = vpop.f32.mrb[33].mxu1  ;;  %v3335_v42 = vld [vmem:[#allocation5 + $0x10] sm:$0xff] }
 0x178   : > { %v1499_v47 = vadd.f32 %v1498_v45, %v414_v3  ;;  %v1500_v49 = vpop.f32.mrb[34].mxu0  ;;  %v1560_v50 = vadd.f32 %v1559_v48, %v422_v6  ;;  %v1561_v51 = vpop.f32.mrb[34].mxu1  ;;  %v450_v48 = vrot.slane %v3335_v42, %v3201_v56 }
 0x179   : > { %2310 = vst [vmem:[%s3219_s6 + $0x440] sm:$0xff] %v1497_v43  ;;  %v1501_v52 = vpop.f32.mrb[35].mxu0  ;;  %2312 = vst [vmem:[%s3219_s6 + $0x450] sm:$0xff] %v1558_v46  ;;  %v1562_v53 = vpop.f32.mrb[35].mxu1  ;;  %v446_v49 = vrot.slane %v3335_v42, %v3204_v0 }
 0x17a   : > { %2311 = vst [vmem:[%s3219_s6 + $0x448] sm:$0xff] %v1499_v47  ;;  %2313 = vst [vmem:[%s3219_s6 + $0x458] sm:$0xff] %v1560_v50  ;;  %v442_v47 = vrot.slane %v3335_v42, %v3196_v18  ;;  %v454_v50 = vrot.slane %v3335_v42, %v3207_v20 }
 0x17e   : > { %v1598_v60 = vpop.f32.mrb[36].mxu0  ;;  %v1659_v63 = vpop.f32.mrb[36].mxu1 }
 0x17f   : > { %v1599_v61 = vadd.f32 %v1598_v60, %v426_v54  ;;  %v1600_v1 = vpop.f32.mrb[37].mxu0  ;;  %v1660_v2 = vadd.f32 %v1659_v63, %v434_v55  ;;  %v1661_v6 = vpop.f32.mrb[37].mxu1 }
 0x180   : > { %v1601_v3 = vadd.f32 %v1600_v1, %v430_v57  ;;  %v1602_v7 = vpop.f32.mrb[38].mxu0  ;;  %v1662_v8 = vadd.f32 %v1661_v6, %v438_v59  ;;  %v1663_v12 = vpop.f32.mrb[38].mxu1 }
 0x181   : > { %2186 = vst [vmem:[%s3219_s6 + $0x60] sm:$0xff] %v1599_v61  ;;  %v1603_v11 = vadd.f32 %v1602_v7, %v426_v54  ;;  %v1604_v13 = vpop.f32.mrb[39].mxu0  ;;  %2188 = vst [vmem:[%s3219_s6 + $0x70] sm:$0xff] %v1660_v2  ;;  %v1664_v58 = vadd.f32 %v1663_v12, %v434_v55  ;;  %v1665_v15 = vpop.f32.mrb[39].mxu1 }
 0x182   : > { %2187 = vst [vmem:[%s3219_s6 + $0x68] sm:$0xff] %v1601_v3  ;;  %v1605_v14 = vadd.f32 %v1604_v13, %v430_v57  ;;  %2189 = vst [vmem:[%s3219_s6 + $0x78] sm:$0xff] %v1662_v8  ;;  %v1666_v16 = vadd.f32 %v1665_v15, %v438_v59 }
 0x183   : > { %2218 = vst [vmem:[%s3219_s6 + $0x160] sm:$0xff] %v1603_v11  ;;  %2220 = vst [vmem:[%s3219_s6 + $0x170] sm:$0xff] %v1664_v58 }
 0x184   : > { %2219 = vst [vmem:[%s3219_s6 + $0x168] sm:$0xff] %v1605_v14  ;;  %2221 = vst [vmem:[%s3219_s6 + $0x178] sm:$0xff] %v1666_v16 }
 0x186   : > { %v1608_v41 = vpop.f32.mrb[40].mxu0  ;;  %v1669_v10 = vpop.f32.mrb[40].mxu1 }
 0x187   : > { %v1609_v17 = vadd.f32 %v1608_v41, %v426_v54  ;;  %v1610_v21 = vpop.f32.mrb[41].mxu0  ;;  %v1670_v22 = vadd.f32 %v1669_v10, %v434_v55  ;;  %v1671_v24 = vpop.f32.mrb[41].mxu1 }
 0x188   : > { %v1611_v23 = vadd.f32 %v1610_v21, %v430_v57  ;;  %v1612_v25 = vpop.f32.mrb[42].mxu0  ;;  %v1672_v26 = vadd.f32 %v1671_v24, %v438_v59  ;;  %v1673_v28 = vpop.f32.mrb[42].mxu1 }
 0x189   : > { %2250 = vst [vmem:[%s3219_s6 + $0x260] sm:$0xff] %v1609_v17  ;;  %v1613_v27 = vadd.f32 %v1612_v25, %v426_v54  ;;  %v1614_v19 = vpop.f32.mrb[43].mxu0  ;;  %2252 = vst [vmem:[%s3219_s6 + $0x270] sm:$0xff] %v1670_v22  ;;  %v1674_v29 = vadd.f32 %v1673_v28, %v434_v55  ;;  %v1675_v31 = vpop.f32.mrb[43].mxu1 }
 0x18a   : > { %2251 = vst [vmem:[%s3219_s6 + $0x268] sm:$0xff] %v1611_v23  ;;  %v1615_v30 = vadd.f32 %v1614_v19, %v430_v57  ;;  %2253 = vst [vmem:[%s3219_s6 + $0x278] sm:$0xff] %v1672_v26  ;;  %v1676_v32 = vadd.f32 %v1675_v31, %v438_v59 }
 0x18b   : > { %2282 = vst [vmem:[%s3219_s6 + $0x360] sm:$0xff] %v1613_v27  ;;  %2284 = vst [vmem:[%s3219_s6 + $0x370] sm:$0xff] %v1674_v29 }
 0x18c   : > { %2283 = vst [vmem:[%s3219_s6 + $0x368] sm:$0xff] %v1615_v30  ;;  %2285 = vst [vmem:[%s3219_s6 + $0x378] sm:$0xff] %v1676_v32 }
 0x18e   : > { %v1618_v33 = vpop.f32.mrb[44].mxu0  ;;  %v1679_v35 = vpop.f32.mrb[44].mxu1 }
 0x18f   : > { %v1619_v34 = vadd.f32 %v1618_v33, %v426_v54  ;;  %v1620_v36 = vpop.f32.mrb[45].mxu0  ;;  %v1680_v37 = vadd.f32 %v1679_v35, %v434_v55  ;;  %v1681_v39 = vpop.f32.mrb[45].mxu1 }
 0x190   : > { %v1621_v38 = vadd.f32 %v1620_v36, %v430_v57  ;;  %v1622_v40 = vpop.f32.mrb[46].mxu0  ;;  %v1682_v43 = vadd.f32 %v1681_v39, %v438_v59  ;;  %v1683_v44 = vpop.f32.mrb[46].mxu1  ;;  %v466_v39 = vrot.slane %v3335_v42, %v3241_v4 }
 0x191   : > { %2314 = vst [vmem:[%s3219_s6 + $0x460] sm:$0xff] %v1619_v34  ;;  %v1623_v45 = vpop.f32.mrb[47].mxu0  ;;  %2316 = vst [vmem:[%s3219_s6 + $0x470] sm:$0xff] %v1680_v37  ;;  %v1684_v46 = vpop.f32.mrb[47].mxu1  ;;  %v462_v40 = vrot.slane %v3335_v42, %v3244_v5 }
 0x192   : > { %2315 = vst [vmem:[%s3219_s6 + $0x468] sm:$0xff] %v1621_v38  ;;  %2317 = vst [vmem:[%s3219_s6 + $0x478] sm:$0xff] %v1682_v43  ;;  %v458_v38 = vrot.slane %v3335_v42, %v3238_v62  ;;  %v470_v43 = vrot.slane %v3335_v42, %v3248_v9 }
 0x196   : > { %v1720_v51 = vpop.f32.mrb[48].mxu0  ;;  %v1781_v53 = vpop.f32.mrb[48].mxu1 }
 0x197   : > { %v1721_v52 = vadd.f32 %v1720_v51, %v442_v47  ;;  %v1722_v54 = vpop.f32.mrb[49].mxu0  ;;  %v1782_v55 = vadd.f32 %v1781_v53, %v450_v48  ;;  %v1783_v59 = vpop.f32.mrb[49].mxu1 }
 0x198   : > { %v1723_v57 = vadd.f32 %v1722_v54, %v446_v49  ;;  %v1724_v60 = vpop.f32.mrb[50].mxu0  ;;  %v1784_v61 = vadd.f32 %v1783_v59, %v454_v50  ;;  %v1785_v1 = vpop.f32.mrb[50].mxu1 }
 0x199   : > { %2190 = vst [vmem:[%s3219_s6 + $0x80] sm:$0xff] %v1721_v52  ;;  %v1725_v63 = vadd.f32 %v1724_v60, %v442_v47  ;;  %v1726_v2 = vpop.f32.mrb[51].mxu0  ;;  %2192 = vst [vmem:[%s3219_s6 + $0x90] sm:$0xff] %v1782_v55  ;;  %v1786_v3 = vadd.f32 %v1785_v1, %v450_v48  ;;  %v1787_v7 = vpop.f32.mrb[51].mxu1 }
 0x19a   : > { %2191 = vst [vmem:[%s3219_s6 + $0x88] sm:$0xff] %v1723_v57  ;;  %v1727_v6 = vadd.f32 %v1726_v2, %v446_v49  ;;  %2193 = vst [vmem:[%s3219_s6 + $0x98] sm:$0xff] %v1784_v61  ;;  %v1788_v8 = vadd.f32 %v1787_v7, %v454_v50 }
 0x19b   : > { %2222 = vst [vmem:[%s3219_s6 + $0x180] sm:$0xff] %v1725_v63  ;;  %2224 = vst [vmem:[%s3219_s6 + $0x190] sm:$0xff] %v1786_v3 }
 0x19c   : > { %2223 = vst [vmem:[%s3219_s6 + $0x188] sm:$0xff] %v1727_v6  ;;  %2225 = vst [vmem:[%s3219_s6 + $0x198] sm:$0xff] %v1788_v8 }
 0x19e   : > { %v1730_v11 = vpop.f32.mrb[52].mxu0  ;;  %v1791_v13 = vpop.f32.mrb[52].mxu1 }
 0x19f   : > { %v1731_v12 = vadd.f32 %v1730_v11, %v442_v47  ;;  %v1732_v58 = vpop.f32.mrb[53].mxu0  ;;  %v1792_v14 = vadd.f32 %v1791_v13, %v450_v48  ;;  %v1793_v16 = vpop.f32.mrb[53].mxu1 }
 0x1a0   : > { %v1733_v15 = vadd.f32 %v1732_v58, %v446_v49  ;;  %v1734_v41 = vpop.f32.mrb[54].mxu0  ;;  %v1794_v17 = vadd.f32 %v1793_v16, %v454_v50  ;;  %v1795_v21 = vpop.f32.mrb[54].mxu1 }
 0x1a1   : > { %2254 = vst [vmem:[%s3219_s6 + $0x280] sm:$0xff] %v1731_v12  ;;  %v1735_v10 = vadd.f32 %v1734_v41, %v442_v47  ;;  %v1736_v22 = vpop.f32.mrb[55].mxu0  ;;  %2256 = vst [vmem:[%s3219_s6 + $0x290] sm:$0xff] %v1792_v14  ;;  %v1796_v23 = vadd.f32 %v1795_v21, %v450_v48  ;;  %v1797_v25 = vpop.f32.mrb[55].mxu1 }
 0x1a2   : > { %2255 = vst [vmem:[%s3219_s6 + $0x288] sm:$0xff] %v1733_v15  ;;  %v1737_v24 = vadd.f32 %v1736_v22, %v446_v49  ;;  %2257 = vst [vmem:[%s3219_s6 + $0x298] sm:$0xff] %v1794_v17  ;;  %v1798_v26 = vadd.f32 %v1797_v25, %v454_v50 }
 0x1a3   : > { %2286 = vst [vmem:[%s3219_s6 + $0x380] sm:$0xff] %v1735_v10  ;;  %2288 = vst [vmem:[%s3219_s6 + $0x390] sm:$0xff] %v1796_v23 }
 0x1a4   : > { %2287 = vst [vmem:[%s3219_s6 + $0x388] sm:$0xff] %v1737_v24  ;;  %2289 = vst [vmem:[%s3219_s6 + $0x398] sm:$0xff] %v1798_v26 }
 0x1a6   : > { %v1740_v27 = vpop.f32.mrb[56].mxu0  ;;  %v1801_v19 = vpop.f32.mrb[56].mxu1 }
 0x1a7   : > { %v1741_v28 = vadd.f32 %v1740_v27, %v442_v47  ;;  %v1742_v29 = vpop.f32.mrb[57].mxu0  ;;  %v1802_v30 = vadd.f32 %v1801_v19, %v450_v48  ;;  %v1803_v32 = vpop.f32.mrb[57].mxu1  ;;  %v3393_v27 = vld [vmem:[#allocation5 + $0x18] sm:$0xff] }
 0x1a8   : > { %v1743_v31 = vadd.f32 %v1742_v29, %v446_v49  ;;  %v1744_v33 = vpop.f32.mrb[58].mxu0  ;;  %v1804_v34 = vadd.f32 %v1803_v32, %v454_v50  ;;  %v1805_v35 = vpop.f32.mrb[58].mxu1  ;;  %v482_v32 = vrot.slane %v3393_v27, %v3201_v56 }
 0x1a9   : > { %2318 = vst [vmem:[%s3219_s6 + $0x480] sm:$0xff] %v1741_v28  ;;  %v1745_v36 = vpop.f32.mrb[59].mxu0  ;;  %2320 = vst [vmem:[%s3219_s6 + $0x490] sm:$0xff] %v1802_v30  ;;  %v1806_v37 = vpop.f32.mrb[59].mxu1  ;;  %v478_v33 = vrot.slane %v3393_v27, %v3204_v0 }
 0x1aa   : > { %2319 = vst [vmem:[%s3219_s6 + $0x488] sm:$0xff] %v1743_v31  ;;  %2321 = vst [vmem:[%s3219_s6 + $0x498] sm:$0xff] %v1804_v34  ;;  %v474_v31 = vrot.slane %v3393_v27, %v3196_v18  ;;  %v486_v34 = vrot.slane %v3393_v27, %v3207_v20 }
 0x1ae   : > { %v1842_v44 = vpop.f32.mrb[60].mxu0  ;;  %v1903_v46 = vpop.f32.mrb[60].mxu1 }
 0x1af   : > { %v1843_v45 = vadd.f32 %v1842_v44, %v458_v38  ;;  %v1844_v47 = vpop.f32.mrb[61].mxu0  ;;  %v1904_v48 = vadd.f32 %v1903_v46, %v466_v39  ;;  %v1905_v50 = vpop.f32.mrb[61].mxu1 }
 0x1b0   : > { %v1845_v49 = vadd.f32 %v1844_v47, %v462_v40  ;;  %v1846_v51 = vpop.f32.mrb[62].mxu0  ;;  %v1906_v52 = vadd.f32 %v1905_v50, %v470_v43  ;;  %v1907_v54 = vpop.f32.mrb[62].mxu1 }
 0x1b1   : > { %2194 = vst [vmem:[%s3219_s6 + $0xa0] sm:$0xff] %v1843_v45  ;;  %v1847_v53 = vadd.f32 %v1846_v51, %v458_v38  ;;  %v1848_v55 = vpop.f32.mrb[63].mxu0  ;;  %2196 = vst [vmem:[%s3219_s6 + $0xb0] sm:$0xff] %v1904_v48  ;;  %v1908_v42 = vadd.f32 %v1907_v54, %v466_v39  ;;  %v1909_v59 = vpop.f32.mrb[63].mxu1 }
 0x1b2   : > { %2195 = vst [vmem:[%s3219_s6 + $0xa8] sm:$0xff] %v1845_v49  ;;  %v1849_v57 = vadd.f32 %v1848_v55, %v462_v40  ;;  %2197 = vst [vmem:[%s3219_s6 + $0xb8] sm:$0xff] %v1906_v52  ;;  %v1910_v60 = vadd.f32 %v1909_v59, %v470_v43 }
 0x1b3   : > { %2226 = vst [vmem:[%s3219_s6 + $0x1a0] sm:$0xff] %v1847_v53  ;;  %2228 = vst [vmem:[%s3219_s6 + $0x1b0] sm:$0xff] %v1908_v42 }
 0x1b4   : > { %2227 = vst [vmem:[%s3219_s6 + $0x1a8] sm:$0xff] %v1849_v57  ;;  %2229 = vst [vmem:[%s3219_s6 + $0x1b8] sm:$0xff] %v1910_v60 }
 0x1b6   : > { %v1852_v61 = vpop.f32.mrb[64].mxu0  ;;  %v1913_v1 = vpop.f32.mrb[64].mxu1 }
 0x1b7   : > { %v1853_v63 = vadd.f32 %v1852_v61, %v458_v38  ;;  %v1854_v2 = vpop.f32.mrb[65].mxu0  ;;  %v1914_v3 = vadd.f32 %v1913_v1, %v466_v39  ;;  %v1915_v7 = vpop.f32.mrb[65].mxu1 }
 0x1b8   : > { %v1855_v6 = vadd.f32 %v1854_v2, %v462_v40  ;;  %v1856_v8 = vpop.f32.mrb[66].mxu0  ;;  %v1916_v11 = vadd.f32 %v1915_v7, %v470_v43  ;;  %v1917_v13 = vpop.f32.mrb[66].mxu1 }
 0x1b9   : > { %2258 = vst [vmem:[%s3219_s6 + $0x2a0] sm:$0xff] %v1853_v63  ;;  %v1857_v12 = vadd.f32 %v1856_v8, %v458_v38  ;;  %v1858_v58 = vpop.f32.mrb[67].mxu0  ;;  %2260 = vst [vmem:[%s3219_s6 + $0x2b0] sm:$0xff] %v1914_v3  ;;  %v1918_v14 = vadd.f32 %v1917_v13, %v466_v39  ;;  %v1919_v16 = vpop.f32.mrb[67].mxu1 }
 0x1ba   : > { %2259 = vst [vmem:[%s3219_s6 + $0x2a8] sm:$0xff] %v1855_v6  ;;  %v1859_v15 = vadd.f32 %v1858_v58, %v462_v40  ;;  %2261 = vst [vmem:[%s3219_s6 + $0x2b8] sm:$0xff] %v1916_v11  ;;  %v1920_v41 = vadd.f32 %v1919_v16, %v470_v43 }
 0x1bb   : > { %2290 = vst [vmem:[%s3219_s6 + $0x3a0] sm:$0xff] %v1857_v12  ;;  %2292 = vst [vmem:[%s3219_s6 + $0x3b0] sm:$0xff] %v1918_v14 }
 0x1bc   : > { %2291 = vst [vmem:[%s3219_s6 + $0x3a8] sm:$0xff] %v1859_v15  ;;  %2293 = vst [vmem:[%s3219_s6 + $0x3b8] sm:$0xff] %v1920_v41 }
 0x1be   : > { %v1862_v17 = vpop.f32.mrb[68].mxu0  ;;  %v1923_v21 = vpop.f32.mrb[68].mxu1 }
 0x1bf   : > { %v1863_v10 = vadd.f32 %v1862_v17, %v458_v38  ;;  %v1864_v22 = vpop.f32.mrb[69].mxu0  ;;  %v1924_v23 = vadd.f32 %v1923_v21, %v466_v39  ;;  %v1925_v25 = vpop.f32.mrb[69].mxu1  ;;  %v498_v21 = vrot.slane %v3393_v27, %v3241_v4 }
 0x1c0   : > { %v1865_v24 = vadd.f32 %v1864_v22, %v462_v40  ;;  %v1866_v26 = vpop.f32.mrb[70].mxu0  ;;  %v1926_v28 = vadd.f32 %v1925_v25, %v470_v43  ;;  %v1927_v19 = vpop.f32.mrb[70].mxu1  ;;  %v494_v22 = vrot.slane %v3393_v27, %v3244_v5 }
 0x1c1   : > { %2322 = vst [vmem:[%s3219_s6 + $0x4a0] sm:$0xff] %v1863_v10  ;;  %v1867_v29 = vpop.f32.mrb[71].mxu0  ;;  %2324 = vst [vmem:[%s3219_s6 + $0x4b0] sm:$0xff] %v1924_v23  ;;  %v1928_v30 = vpop.f32.mrb[71].mxu1  ;;  %v490_v10 = vrot.slane %v3393_v27, %v3238_v62  ;;  %v502_v23 = vrot.slane %v3393_v27, %v3248_v9 }
 0x1c2   : > { %2323 = vst [vmem:[%s3219_s6 + $0x4a8] sm:$0xff] %v1865_v24  ;;  %2325 = vst [vmem:[%s3219_s6 + $0x4b8] sm:$0xff] %v1926_v28 }
 0x1c6   : > { %v1964_v35 = vpop.f32.mrb[72].mxu0  ;;  %v2025_v37 = vpop.f32.mrb[72].mxu1 }
 0x1c7   : > { %v1965_v36 = vadd.f32 %v1964_v35, %v474_v31  ;;  %v1966_v38 = vpop.f32.mrb[73].mxu0  ;;  %v2026_v39 = vadd.f32 %v2025_v37, %v482_v32  ;;  %v2027_v18 = vpop.f32.mrb[73].mxu1 }
 0x1c8   : > { %v1967_v40 = vadd.f32 %v1966_v38, %v478_v33  ;;  %v1968_v56 = vpop.f32.mrb[74].mxu0  ;;  %v2028_v43 = vadd.f32 %v2027_v18, %v486_v34  ;;  %v2029_v44 = vpop.f32.mrb[74].mxu1 }
 0x1c9   : > { %2198 = vst [vmem:[%s3219_s6 + $0xc0] sm:$0xff] %v1965_v36  ;;  %v1969_v0 = vadd.f32 %v1968_v56, %v474_v31  ;;  %v1970_v45 = vpop.f32.mrb[75].mxu0  ;;  %2200 = vst [vmem:[%s3219_s6 + $0xd0] sm:$0xff] %v2026_v39  ;;  %v2030_v20 = vadd.f32 %v2029_v44, %v482_v32  ;;  %v2031_v47 = vpop.f32.mrb[75].mxu1 }
 0x1ca   : > { %2199 = vst [vmem:[%s3219_s6 + $0xc8] sm:$0xff] %v1967_v40  ;;  %v1971_v46 = vadd.f32 %v1970_v45, %v478_v33  ;;  %2201 = vst [vmem:[%s3219_s6 + $0xd8] sm:$0xff] %v2028_v43  ;;  %v2032_v48 = vadd.f32 %v2031_v47, %v486_v34 }
 0x1cb   : > { %2230 = vst [vmem:[%s3219_s6 + $0x1c0] sm:$0xff] %v1969_v0  ;;  %2232 = vst [vmem:[%s3219_s6 + $0x1d0] sm:$0xff] %v2030_v20 }
 0x1cc   : > { %2231 = vst [vmem:[%s3219_s6 + $0x1c8] sm:$0xff] %v1971_v46  ;;  %2233 = vst [vmem:[%s3219_s6 + $0x1d8] sm:$0xff] %v2032_v48 }
 0x1ce   : > { %v1974_v49 = vpop.f32.mrb[76].mxu0  ;;  %v2035_v51 = vpop.f32.mrb[76].mxu1 }
 0x1cf   : > { %v1975_v50 = vadd.f32 %v1974_v49, %v474_v31  ;;  %v1976_v52 = vpop.f32.mrb[77].mxu0  ;;  %v2036_v53 = vadd.f32 %v2035_v51, %v482_v32  ;;  %v2037_v55 = vpop.f32.mrb[77].mxu1 }
 0x1d0   : > { %v1977_v54 = vadd.f32 %v1976_v52, %v478_v33  ;;  %v1978_v42 = vpop.f32.mrb[78].mxu0  ;;  %v2038_v57 = vadd.f32 %v2037_v55, %v486_v34  ;;  %v2039_v60 = vpop.f32.mrb[78].mxu1 }
 0x1d1   : > { %2262 = vst [vmem:[%s3219_s6 + $0x2c0] sm:$0xff] %v1975_v50  ;;  %v1979_v59 = vadd.f32 %v1978_v42, %v474_v31  ;;  %v1980_v61 = vpop.f32.mrb[79].mxu0  ;;  %2264 = vst [vmem:[%s3219_s6 + $0x2d0] sm:$0xff] %v2036_v53  ;;  %v2040_v63 = vadd.f32 %v2039_v60, %v482_v32  ;;  %v2041_v2 = vpop.f32.mrb[79].mxu1 }
 0x1d2   : > { %2263 = vst [vmem:[%s3219_s6 + $0x2c8] sm:$0xff] %v1977_v54  ;;  %v1981_v1 = vadd.f32 %v1980_v61, %v478_v33  ;;  %2265 = vst [vmem:[%s3219_s6 + $0x2d8] sm:$0xff] %v2038_v57  ;;  %v2042_v3 = vadd.f32 %v2041_v2, %v486_v34 }
 0x1d3   : > { %2294 = vst [vmem:[%s3219_s6 + $0x3c0] sm:$0xff] %v1979_v59  ;;  %2296 = vst [vmem:[%s3219_s6 + $0x3d0] sm:$0xff] %v2040_v63 }
 0x1d4   : > { %2295 = vst [vmem:[%s3219_s6 + $0x3c8] sm:$0xff] %v1981_v1  ;;  %2297 = vst [vmem:[%s3219_s6 + $0x3d8] sm:$0xff] %v2042_v3 }
 0x1d6   : > { %v1984_v6 = vpop.f32.mrb[80].mxu0  ;;  %v2045_v8 = vpop.f32.mrb[80].mxu1 }
 0x1d7   : > { %v1985_v7 = vadd.f32 %v1984_v6, %v474_v31  ;;  %v1986_v11 = vpop.f32.mrb[81].mxu0  ;;  %v2046_v12 = vadd.f32 %v2045_v8, %v482_v32  ;;  %v2047_v58 = vpop.f32.mrb[81].mxu1 }
 0x1d8   : > { %v1987_v13 = vadd.f32 %v1986_v11, %v478_v33  ;;  %v1988_v14 = vpop.f32.mrb[82].mxu0  ;;  %v2048_v15 = vadd.f32 %v2047_v58, %v486_v34  ;;  %v2049_v16 = vpop.f32.mrb[82].mxu1 }
 0x1d9   : > { %2326 = vst [vmem:[%s3219_s6 + $0x4c0] sm:$0xff] %v1985_v7  ;;  %v1989_v41 = vpop.f32.mrb[83].mxu0  ;;  %2328 = vst [vmem:[%s3219_s6 + $0x4d0] sm:$0xff] %v2046_v12  ;;  %v2050_v17 = vpop.f32.mrb[83].mxu1 }
 0x1da   : > { %2327 = vst [vmem:[%s3219_s6 + $0x4c8] sm:$0xff] %v1987_v13  ;;  %2329 = vst [vmem:[%s3219_s6 + $0x4d8] sm:$0xff] %v2048_v15 }
 0x1de   : > { %v2086_v24 = vpop.f32.mrb[84].mxu0  ;;  %v2147_v26 = vpop.f32.mrb[84].mxu1 }
 0x1df   : > { %v2087_v25 = vadd.f32 %v2086_v24, %v490_v10  ;;  %v2088_v28 = vpop.f32.mrb[85].mxu0  ;;  %v2148_v19 = vadd.f32 %v2147_v26, %v498_v21  ;;  %v2149_v62 = vpop.f32.mrb[85].mxu1 }
 0x1e0   : > { %v2089_v29 = vadd.f32 %v2088_v28, %v494_v22  ;;  %v2090_v4 = vpop.f32.mrb[86].mxu0  ;;  %v2150_v30 = vadd.f32 %v2149_v62, %v502_v23  ;;  %v2151_v31 = vpop.f32.mrb[86].mxu1 }
 0x1e1   : > { %2202 = vst [vmem:[%s3219_s6 + $0xe0] sm:$0xff] %v2087_v25  ;;  %v2091_v5 = vadd.f32 %v2090_v4, %v490_v10  ;;  %v2092_v32 = vpop.f32.mrb[87].mxu0  ;;  %2204 = vst [vmem:[%s3219_s6 + $0xf0] sm:$0xff] %v2148_v19  ;;  %v2152_v9 = vadd.f32 %v2151_v31, %v498_v21  ;;  %v2153_v33 = vpop.f32.mrb[87].mxu1 }
 0x1e2   : > { %2203 = vst [vmem:[%s3219_s6 + $0xe8] sm:$0xff] %v2089_v29  ;;  %v2093_v27 = vadd.f32 %v2092_v32, %v494_v22  ;;  %2205 = vst [vmem:[%s3219_s6 + $0xf8] sm:$0xff] %v2150_v30  ;;  %v2154_v34 = vadd.f32 %v2153_v33, %v502_v23 }
 0x1e3   : > { %2234 = vst [vmem:[%s3219_s6 + $0x1e0] sm:$0xff] %v2091_v5  ;;  %2236 = vst [vmem:[%s3219_s6 + $0x1f0] sm:$0xff] %v2152_v9 }
 0x1e4   : > { %2235 = vst [vmem:[%s3219_s6 + $0x1e8] sm:$0xff] %v2093_v27  ;;  %2237 = vst [vmem:[%s3219_s6 + $0x1f8] sm:$0xff] %v2154_v34 }
 0x1e6   : > { %v2096_v35 = vpop.f32.mrb[88].mxu0  ;;  %v2157_v37 = vpop.f32.mrb[88].mxu1 }
 0x1e7   : > { %v2097_v36 = vadd.f32 %v2096_v35, %v490_v10  ;;  %v2098_v38 = vpop.f32.mrb[89].mxu0  ;;  %v2158_v39 = vadd.f32 %v2157_v37, %v498_v21  ;;  %v2159_v18 = vpop.f32.mrb[89].mxu1 }
 0x1e8   : > { %v2099_v40 = vadd.f32 %v2098_v38, %v494_v22  ;;  %v2100_v56 = vpop.f32.mrb[90].mxu0  ;;  %v2160_v43 = vadd.f32 %v2159_v18, %v502_v23  ;;  %v2161_v44 = vpop.f32.mrb[90].mxu1 }
 0x1e9   : > { %2266 = vst [vmem:[%s3219_s6 + $0x2e0] sm:$0xff] %v2097_v36  ;;  %v2101_v0 = vadd.f32 %v2100_v56, %v490_v10  ;;  %v2102_v45 = vpop.f32.mrb[91].mxu0  ;;  %2268 = vst [vmem:[%s3219_s6 + $0x2f0] sm:$0xff] %v2158_v39  ;;  %v2162_v20 = vadd.f32 %v2161_v44, %v498_v21  ;;  %v2163_v47 = vpop.f32.mrb[91].mxu1 }
 0x1ea   : > { %2267 = vst [vmem:[%s3219_s6 + $0x2e8] sm:$0xff] %v2099_v40  ;;  %v2103_v46 = vadd.f32 %v2102_v45, %v494_v22  ;;  %2269 = vst [vmem:[%s3219_s6 + $0x2f8] sm:$0xff] %v2160_v43  ;;  %v2164_v48 = vadd.f32 %v2163_v47, %v502_v23 }
 0x1eb   : > { %2298 = vst [vmem:[%s3219_s6 + $0x3e0] sm:$0xff] %v2101_v0  ;;  %2300 = vst [vmem:[%s3219_s6 + $0x3f0] sm:$0xff] %v2162_v20 }
 0x1ec   : > { %2299 = vst [vmem:[%s3219_s6 + $0x3e8] sm:$0xff] %v2103_v46  ;;  %2301 = vst [vmem:[%s3219_s6 + $0x3f8] sm:$0xff] %v2164_v48 }
 0x1ee   : > { %v2106_v49 = vpop.f32.mrb[92].mxu0  ;;  %v2167_v51 = vpop.f32.mrb[92].mxu1 }
 0x1ef   : > { %v2107_v50 = vadd.f32 %v2106_v49, %v490_v10  ;;  %v2108_v52 = vpop.f32.mrb[93].mxu0  ;;  %v2168_v53 = vadd.f32 %v2167_v51, %v498_v21  ;;  %v2169_v55 = vpop.f32.mrb[93].mxu1 }
 0x1f0   : > { %v2109_v54 = vadd.f32 %v2108_v52, %v494_v22  ;;  %v2110_v42 = vpop.f32.mrb[94].mxu0  ;;  %v2170_v57 = vadd.f32 %v2169_v55, %v502_v23  ;;  %v2171_v59 = vpop.f32.mrb[94].mxu1 }
 0x1f1   : > { %2330 = vst [vmem:[%s3219_s6 + $0x4e0] sm:$0xff] %v2107_v50  ;;  %v2111_v60 = vpop.f32.mrb[95].mxu0  ;;  %2332 = vst [vmem:[%s3219_s6 + $0x4f0] sm:$0xff] %v2168_v53  ;;  %v2172_v61 = vpop.f32.mrb[95].mxu1 }
 0x1f2   : > { %2331 = vst [vmem:[%s3219_s6 + $0x4e8] sm:$0xff] %v2109_v54  ;;  %2333 = vst [vmem:[%s3219_s6 + $0x4f8] sm:$0xff] %v2170_v57 }
 0x1f3   : > { %2800 = shalt.err (!%p2797_p6)
}
 0x1f4   : > { %s2801_s30 = scalar_lea.hbm %s3456_s11, 20480  ;;  %s2805_s5 = scalar_lea.hbm %s3515_s3, 40960 }
 0x1f5   : > { %p2802_p7 = scmp.ne.s32.totalorder %s3456_s11, %s2801_s30  ;;  %p2806_p0 = scmp.lt.u32.totalorder %s3456_s11, %s3515_s3 }
 0x1f6   : > { %p2807_p4 = scmp.lt.u32.totalorder %s2805_s5, %s2801_s30  ;;  %p2809_p1 = scmp.lt.u32.totalorder %s2801_s30, %s3456_s11 }
 0x1f7   : > { %p2803_p9 = pnand %p2802_p7, %p3527_p8 }
 0x1f8   : > { %p2808_p13 = por %p2807_p4, %p2806_p0 }
 0x1f9   : > { %p2804_p12 = pneg %p2803_p9 }
 0x1fa   : > { %p2810_p10 = por %p2809_p1, %p2808_p13 }
 0x1fc   : > { %p2811_p11 = pnand %p2810_p10, %p2804_p12 }
 0x1fe   : > { %2814 = shalt.err (!%p2811_p11)
}
 0x1ff   : > { %s2881_s4 = smov 4096   ;;  %s2882_s6 = smov 256  }
 0x200   : > { %2655 = dma.vmem_to_hbm [thread:$0]  (%p3527_p8), %s3458_s8, 20480, %s3456_s11, %s3466_s15, %s2881_s4, %s2881_s4, %s2882_s6  }
 0x201 PF: > { %p2672_p2 = scmp.ge.s32.totalorder %s2873_s17, 2  ;;  %s2366_s7 = sand.u32 1, %s2853_s12  }
 0x202   : > { %p3528_p3 = scmp.ne.s32.totalorder %s3521_s24, 0  ;;  %s2367_s9 = scalar_lea.sflag [#allocation4], %s2366_s7 }
 0x204   : > { %p2665_p5 = pnand %p2672_p2, %p3528_p3 }
 0x206   : > { %2848 = dma.done.wait (!%p2665_p5), %s2367_s9, 20480  }
 0x207   : > { %2850 = vsyncadd (!%p2665_p5), %s2367_s9, 4294946816  ;;  %s18_s17 = sadd.s32 1, %s2873_s17   ;;  %s3529_s12 = smov %s2857_s13 }
 0x208   : > { %p15_p6 = scmp.ge.s32.totalorder %s18_s17, 4   ;;  %s3530_s13 = smov %s2861_s14 }
 0x209   : > { %s3531_s14 = smov %s2956_s25  ;;  %s3532_s15 = smov %s2869_s16 }
 0x20a   : > { %s3533_s16 = smov %s3535_s20  ;;  %17 = sbr.rel (!%p15_p6) target bundleno = 6 (0x6), region = 78 }
 0x211   :  { %2372 = vsyncpa [#allocation3], 1 }
 0x212   :  { %2374 = vsyncpa [#allocation3 + $0x1], 1 }
 0x213   :  { %2375 = vsyncpa [#allocation6], 1 }
 0x214   :  { %2376 = vsyncpa [#allocation4], 1 }
 0x215   :  { %2378 = vsyncpa [#allocation4 + $0x1], 1 }

</bundles_post_ra>
